<compile_context>
chip_gen: v6e
topology: v6e:2x2x1
jax: 0.10.0
libtpu: 0.0.40
codegen_flags: <defaults>
</compile_context>

<pallas_src>
import functools

import jax
import jax.numpy as jnp
from jax.experimental import pallas as pl
from jax.experimental.pallas import tpu as pltpu

LANES = 128
NEG_INF = -1e30
VMEM_LIMIT = 32 * 1024 * 1024       # safe on v5e/v6e/v7x; tiles sized well under it
CONV_TILE_GROUPS = 1024             # pool groups per grid step (4096 patch rows)
MLP_TILE_ROWS = 256                 # batch rows per grid step


def _round_up(x, m):
    return (x + m - 1) // m * m


# ----------------------------------------------------------------------------
# Pallas kernels
# ----------------------------------------------------------------------------
def _conv_pool_relu_kernel(p_ref, w_ref, b_ref, o_ref, *, tm):
    """Fused conv(as one matmul) + 2x2 max-pool + bias + ReLU.

    p_ref: (4*tm, D) bf16 -- tap-major within tile (tap t rows = [t*tm, (t+1)*tm))
    w_ref: (D, 128)  bf16 -- output channels zero-padded to 128 lanes
    b_ref: (1, 128)  f32
    o_ref: (tm, 128) bf16
    """
    acc = jnp.dot(p_ref[...], w_ref[...], preferred_element_type=jnp.float32)
    m = jnp.maximum(jnp.maximum(acc[0 * tm:1 * tm], acc[1 * tm:2 * tm]),
                    jnp.maximum(acc[2 * tm:3 * tm], acc[3 * tm:4 * tm]))
    # relu(max_t(x_t @ W) + b) == relu(max_t(x_t @ W + b))  (bias shared over taps)
    o_ref[...] = jnp.maximum(m + b_ref[...], 0.0).astype(o_ref.dtype)


def _mlp_logsoftmax_kernel(x_ref, w1_ref, b1_ref, w2_ref, b2_ref, o_ref):
    """fc1 -> relu -> (dropout = identity) -> fc2 -> log_softmax, 128-lane padded."""
    h = jnp.dot(x_ref[...], w1_ref[...], preferred_element_type=jnp.float32) + b1_ref[...]
    h = jnp.maximum(h, 0.0).astype(jnp.bfloat16)
    logits = jnp.dot(h, w2_ref[...], preferred_element_type=jnp.float32) + b2_ref[...]
    # padded logit lanes carry a -1e30 bias -> exp underflows to 0 -> exact softmax
    mx = jnp.max(logits, axis=-1, keepdims=True)
    lse = mx + jnp.log(jnp.sum(jnp.exp(logits - mx), axis=-1, keepdims=True))
    o_ref[...] = logits - lse


# ----------------------------------------------------------------------------
# Pallas wrappers (gridded over rows, weights resident across the grid)
# ----------------------------------------------------------------------------
def conv_pool_relu(p3, w_pad, b_pad, *, max_groups=CONV_TILE_GROUPS):
    """p3: (4, M, D) pool-tap patches -> (M, 128) bf16 pooled+relu'd activations."""
    _, m_total, d = p3.shape
    tm = _round_up(min(max_groups, m_total), 8)
    m_pad = _round_up(m_total, tm)
    if m_pad != m_total:
        p3 = jnp.pad(p3, ((0, 0), (0, m_pad - m_total), (0, 0)))
    n_tiles = m_pad // tm
    # 2-D, tile-major, tap-major-within-tile layout: block = contiguous (4*tm, D)
    p2 = (p3.reshape(4, n_tiles, tm, d)
             .transpose(1, 0, 2, 3)
             .reshape(n_tiles * 4 * tm, d)
             .astype(jnp.bfloat16))

    out = pl.pallas_call(
        functools.partial(_conv_pool_relu_kernel, tm=tm),
        out_shape=jax.ShapeDtypeStruct((m_pad, LANES), jnp.bfloat16),
        grid_spec=pltpu.PrefetchScalarGridSpec(
            num_scalar_prefetch=0,
            grid=(n_tiles,),
            in_specs=[pl.BlockSpec((4 * tm, d), lambda i: (i, 0)),
                      pl.BlockSpec((d, LANES), lambda i: (0, 0)),
                      pl.BlockSpec((1, LANES), lambda i: (0, 0))],
            out_specs=pl.BlockSpec((tm, LANES), lambda i: (i, 0))),
        compiler_params=pltpu.CompilerParams(
            dimension_semantics=("parallel",),
            vmem_limit_bytes=VMEM_LIMIT),
    )(p2, w_pad, b_pad)
    return out[:m_total]


def mlp_logsoftmax(x, w1, b1, w2, b2, *, max_rows=MLP_TILE_ROWS):
    """x: (N, 2048) padded-NHWC flatten -> (N, 10) log-probabilities (f32)."""
    n, k = x.shape
    tn = _round_up(min(max_rows, n), 8)
    n_pad = _round_up(n, tn)
    if n_pad != n:
        x = jnp.pad(x, ((0, n_pad - n), (0, 0)))

    out = pl.pallas_call(
        _mlp_logsoftmax_kernel,
        out_shape=jax.ShapeDtypeStruct((n_pad, LANES), jnp.float32),
        grid_spec=pltpu.PrefetchScalarGridSpec(
            num_scalar_prefetch=0,
            grid=(n_pad // tn,),
            in_specs=[pl.BlockSpec((tn, k), lambda i: (i, 0)),
                      pl.BlockSpec((k, LANES), lambda i: (0, 0)),
                      pl.BlockSpec((1, LANES), lambda i: (0, 0)),
                      pl.BlockSpec((LANES, LANES), lambda i: (0, 0)),
                      pl.BlockSpec((1, LANES), lambda i: (0, 0))],
            out_specs=pl.BlockSpec((tn, LANES), lambda i: (i, 0))),
        compiler_params=pltpu.CompilerParams(
            dimension_semantics=("parallel",),
            vmem_limit_bytes=VMEM_LIMIT),
    )(x.astype(jnp.bfloat16), w1, b1, w2, b2)
    return out[:n, :10]


# ----------------------------------------------------------------------------
# Plain-JAX glue: im2col + pool-window restructuring (pure index shuffling)
# ----------------------------------------------------------------------------
def im2col(x_nhwc, k):
    """(N,H,W,C) -> (N, OH, OW, k*k*C), tap order (kh, kw, ic)."""
    n, h, w, c = x_nhwc.shape
    oh, ow = h - k + 1, w - k + 1
    cols = [x_nhwc[:, kh:kh + oh, kw:kw + ow, :] for kh in range(k) for kw in range(k)]
    return jnp.concatenate(cols, axis=-1)


def pool_groups(patches):
    """(N, OH, OW, D) -> (4, N*OH/2*OW/2, D); axis 0 enumerates the 2x2 pool window."""
    n, oh, ow, d = patches.shape
    p = patches.reshape(n, oh // 2, 2, ow // 2, 2, d)
    p = jnp.transpose(p, (2, 4, 0, 1, 3, 5))
    return p.reshape(4, n * (oh // 2) * (ow // 2), d)


# ----------------------------------------------------------------------------
# Parameter packing (torch layouts -> lane-dense, permuted, bf16 matrices)
# ----------------------------------------------------------------------------
def conv_weight_to_mat(w):
    """(OC, IC, KH, KW) torch -> (KH*KW*IC, 128) bf16, OC zero-padded to 128 lanes."""
    oc = w.shape[0]
    m = jnp.transpose(w, (2, 3, 1, 0)).reshape(-1, oc)
    return jnp.pad(m, ((0, 0), (0, LANES - oc))).astype(jnp.bfloat16)


def fc1_weight_to_mat(fc1_w):
    """(50, 320) torch (input order c*16+ph*4+pw) -> (16*128, 128) bf16 whose row
    order matches the padded-NHWC flatten (ph*4+pw)*128 + c (removes the runtime
    NHWC->NCHW transpose)."""
    w = fc1_w.T.reshape(20, 4, 4, 50)              # [c, ph, pw, out]
    w = jnp.transpose(w, (1, 2, 0, 3))             # [ph, pw, c, out]
    w = jnp.pad(w, ((0, 0), (0, 0), (0, LANES - 20), (0, 0)))
    w = w.reshape(16 * LANES, 50)
    return jnp.pad(w, ((0, 0), (0, LANES - 50))).astype(jnp.bfloat16)


def fc2_weight_to_mat(fc2_w):
    """(10, 50) torch -> (128, 128) bf16, zero-padded rows (hidden) and cols (logits)."""
    w = fc2_w.T                                    # (50, 10)
    return jnp.pad(w, ((0, LANES - 50), (0, LANES - 10))).astype(jnp.bfloat16)


def pad_bias(b, pad_value=0.0):
    return jnp.pad(b, (0, LANES - b.shape[0]), constant_values=pad_value
                   ).reshape(1, LANES).astype(jnp.float32)


def init_params(key):
    ks = jax.random.split(key, 8)
    conv1_w = 0.1 * jax.random.normal(ks[0], (10, 1, 5, 5), jnp.float32)
    conv1_b = 0.1 * jax.random.normal(ks[1], (10,), jnp.float32)
    conv2_w = 0.1 * jax.random.normal(ks[2], (20, 10, 5, 5), jnp.float32)
    conv2_b = 0.1 * jax.random.normal(ks[3], (20,), jnp.float32)
    fc1_w = 0.05 * jax.random.normal(ks[4], (50, 320), jnp.float32)   # torch (out, in)
    fc1_b = 0.05 * jax.random.normal(ks[5], (50,), jnp.float32)
    fc2_w = 0.1 * jax.random.normal(ks[6], (10, 50), jnp.float32)
    fc2_b = 0.1 * jax.random.normal(ks[7], (10,), jnp.float32)
    return {
        "conv1_wm": conv_weight_to_mat(conv1_w),         # (25, 128) bf16
        "conv1_b": pad_bias(conv1_b),                    # (1, 128) f32
        "conv2_wm": conv_weight_to_mat(conv2_w),         # (250, 128) bf16
        "conv2_b": pad_bias(conv2_b),                    # (1, 128) f32
        "fc1_wm": fc1_weight_to_mat(fc1_w),              # (2048, 128) bf16
        "fc1_b": pad_bias(fc1_b),                        # (1, 128) f32
        "fc2_wm": fc2_weight_to_mat(fc2_w),              # (128, 128) bf16
        "fc2_b": pad_bias(fc2_b, pad_value=NEG_INF),     # (1, 128) f32, -1e30 pads
    }


# ----------------------------------------------------------------------------
# Forward pass (mirrors Net.forward, eval-mode dropout)
# ----------------------------------------------------------------------------
def net_forward(x_nchw, params):
    n = x_nchw.shape[0]
    x = jnp.transpose(x_nchw, (0, 2, 3, 1)).astype(jnp.bfloat16)   # NCHW -> NHWC

    # conv1 -> maxpool(2) -> relu   (28x28 -> 24x24 -> 12x12, 10 channels)
    p1 = pool_groups(im2col(x, 5))                                 # (4, N*144, 25)
    h1 = conv_pool_relu(p1, params["conv1_wm"], params["conv1_b"]) # (N*144, 128) bf16
    h1 = h1[:, :10].reshape(n, 12, 12, 10)

    # conv2 -> dropout2d(identity) -> maxpool(2) -> relu  (12x12 -> 8x8 -> 4x4, 20 ch)
    p2 = pool_groups(im2col(h1, 5))                                # (4, N*16, 250)
    h2 = conv_pool_relu(p2, params["conv2_wm"], params["conv2_b"]) # (N*16, 128) bf16

    # Flatten in padded-NHWC order (free contiguous reshape); fc1 rows were permuted
    # and zero-padded at init to reproduce torch's view(-1, 320) NCHW flatten order.
    flat = h2.reshape(n, 16 * LANES)                               # (N, 2048)

    # fc1 -> relu -> dropout(identity) -> fc2 -> log_softmax
    return mlp_logsoftmax(flat, params["fc1_wm"], params["fc1_b"],
                          params["fc2_wm"], params["fc2_b"])


if __name__ == "__main__":
    key = jax.random.PRNGKey(0)
    pkey, xkey = jax.random.split(key)
    params = init_params(pkey)
    # MNIST-shaped input (the 320-dim flatten forces 28x28 spatial); small batch.
    x = jax.random.normal(xkey, (2, 1, 28, 28), jnp.float32)

    out = jax.jit(net_forward)(x, params)
    out = jax.block_until_ready(out)

    assert out.shape == (2, 10)
    # log_softmax rows must (approximately) exponentiate-sum to 1
    assert bool(jnp.all(jnp.abs(jnp.sum(jnp.exp(out), axis=-1) - 1.0) < 1e-4))
    print("KERNEL_OK")
</pallas_src>

<mosaic_0001>
module attributes {stable_mosaic.version = 11 : i64} {
  func.func @_conv_pool_relu_kernel(%arg0: i32, %arg1: memref<1152x25xbf16, #tpu.memory_space<vmem>>, %arg2: memref<25x128xbf16, #tpu.memory_space<vmem>>, %arg3: memref<1x128xf32, #tpu.memory_space<vmem>>, %arg4: memref<288x128xbf16, #tpu.memory_space<vmem>>) attributes {dimension_semantics = [#tpu.dimension_semantics<parallel>], iteration_bounds = array<i64: 1>, scalar_prefetch = 0 : i64, scratch_operands = 0 : i64, tpu.core_type = #tpu.core_type<tc>, window_params = [{transform_indices = @transform_0, window_bounds = array<i64: 1152, 25>}, {pipeline_mode = #tpu.pipeline_mode<synchronous>, transform_indices = @transform_1, window_bounds = array<i64: 25, 128>}, {pipeline_mode = #tpu.pipeline_mode<synchronous>, transform_indices = @transform_2, window_bounds = array<i64: 1, 128>}, {transform_indices = @transform_3, window_bounds = array<i64: 288, 128>}]} {
    %c0 = arith.constant 0 : index
    %c0_0 = arith.constant 0 : index
    %0 = vector.load %arg1[%c0, %c0_0] : memref<1152x25xbf16, #tpu.memory_space<vmem>>, vector<1152x25xbf16>
    %c0_1 = arith.constant 0 : index
    %c0_2 = arith.constant 0 : index
    %1 = vector.load %arg2[%c0_1, %c0_2] : memref<25x128xbf16, #tpu.memory_space<vmem>>, vector<25x128xbf16>
    %cst = arith.constant dense<0.000000e+00> : vector<1152x128xf32>
    %2 = tpu.matmul %0, %1, %cst {dimension_numbers = #tpu.dot_dimension_numbers<[1], [0], [0], [1], [0, 0, 1, 1], [], []>} : vector<1152x25xbf16>, vector<25x128xbf16>, vector<1152x128xf32> -> vector<1152x128xf32>
    %3 = vector.extract_strided_slice %2 {offsets = [0, 0], sizes = [288, 128], strides = [1, 1]} : vector<1152x128xf32> to vector<288x128xf32>
    %4 = vector.extract_strided_slice %2 {offsets = [288, 0], sizes = [288, 128], strides = [1, 1]} : vector<1152x128xf32> to vector<288x128xf32>
    %5 = arith.maximumf %3, %4 : vector<288x128xf32>
    %6 = vector.extract_strided_slice %2 {offsets = [576, 0], sizes = [288, 128], strides = [1, 1]} : vector<1152x128xf32> to vector<288x128xf32>
    %7 = vector.extract_strided_slice %2 {offsets = [864, 0], sizes = [288, 128], strides = [1, 1]} : vector<1152x128xf32> to vector<288x128xf32>
    %8 = arith.maximumf %6, %7 : vector<288x128xf32>
    %9 = arith.maximumf %5, %8 : vector<288x128xf32>
    %c0_3 = arith.constant 0 : index
    %c0_4 = arith.constant 0 : index
    %10 = vector.load %arg3[%c0_3, %c0_4] : memref<1x128xf32, #tpu.memory_space<vmem>>, vector<1x128xf32>
    %11 = vector.broadcast %10 : vector<1x128xf32> to vector<288x128xf32>
    %12 = arith.addf %9, %11 : vector<288x128xf32>
    %cst_5 = arith.constant 0.000000e+00 : f32
    %13 = vector.broadcast %cst_5 : f32 to vector<288x128xf32>
    %14 = arith.maximumf %12, %13 : vector<288x128xf32>
    %15 = arith.truncf %14 : vector<288x128xf32> to vector<288x128xbf16>
    %c0_6 = arith.constant 0 : index
    %c0_7 = arith.constant 0 : index
    %16 = vector.load %arg4[%c0_6, %c0_7] : memref<288x128xbf16, #tpu.memory_space<vmem>>, vector<288x128xbf16>
    tpu.vector_store %arg4[%c0_6, %c0_7], %15 {strides = array<i32>} : memref<288x128xbf16, #tpu.memory_space<vmem>>, vector<288x128xbf16>,
    return
  }
  func.func @transform_0(%arg0: i32) -> (i32, i32) {
    %c0_i32 = arith.constant 0 : i32
    %c0_i32_0 = arith.constant 0 : i32
    return %arg0, %c0_i32 : i32, i32
  }
  func.func @transform_1(%arg0: i32) -> (i32, i32) {
    %c0_i32 = arith.constant 0 : i32
    %c0_i32_0 = arith.constant 0 : i32
    %c0_i32_1 = arith.constant 0 : i32
    return %c0_i32, %c0_i32_0 : i32, i32
  }
  func.func @transform_2(%arg0: i32) -> (i32, i32) {
    %c0_i32 = arith.constant 0 : i32
    %c0_i32_0 = arith.constant 0 : i32
    %c0_i32_1 = arith.constant 0 : i32
    return %c0_i32, %c0_i32_0 : i32, i32
  }
  func.func @transform_3(%arg0: i32) -> (i32, i32) {
    %c0_i32 = arith.constant 0 : i32
    %c0_i32_0 = arith.constant 0 : i32
    return %arg0, %c0_i32 : i32, i32
  }
}

module attributes {stable_mosaic.version = 11 : i64} {
  func.func @_conv_pool_relu_kernel(%arg0: i32, %arg1: memref<128x250xbf16, #tpu.memory_space<vmem>>, %arg2: memref<250x128xbf16, #tpu.memory_space<vmem>>, %arg3: memref<1x128xf32, #tpu.memory_space<vmem>>, %arg4: memref<32x128xbf16, #tpu.memory_space<vmem>>) attributes {dimension_semantics = [#tpu.dimension_semantics<parallel>], iteration_bounds = array<i64: 1>, scalar_prefetch = 0 : i64, scratch_operands = 0 : i64, tpu.core_type = #tpu.core_type<tc>, window_params = [{transform_indices = @transform_0, window_bounds = array<i64: 128, 250>}, {pipeline_mode = #tpu.pipeline_mode<synchronous>, transform_indices = @transform_1, window_bounds = array<i64: 250, 128>}, {pipeline_mode = #tpu.pipeline_mode<synchronous>, transform_indices = @transform_2, window_bounds = array<i64: 1, 128>}, {transform_indices = @transform_3, window_bounds = array<i64: 32, 128>}]} {
    %c0 = arith.constant 0 : index
    %c0_0 = arith.constant 0 : index
    %0 = vector.load %arg1[%c0, %c0_0] : memref<128x250xbf16, #tpu.memory_space<vmem>>, vector<128x250xbf16>
    %c0_1 = arith.constant 0 : index
    %c0_2 = arith.constant 0 : index
    %1 = vector.load %arg2[%c0_1, %c0_2] : memref<250x128xbf16, #tpu.memory_space<vmem>>, vector<250x128xbf16>
    %cst = arith.constant dense<0.000000e+00> : vector<128x128xf32>
    %2 = tpu.matmul %0, %1, %cst {dimension_numbers = #tpu.dot_dimension_numbers<[1], [0], [0], [1], [0, 0, 1, 1], [], []>} : vector<128x250xbf16>, vector<250x128xbf16>, vector<128x128xf32> -> vector<128x128xf32>
    %3 = vector.extract_strided_slice %2 {offsets = [0, 0], sizes = [32, 128], strides = [1, 1]} : vector<128x128xf32> to vector<32x128xf32>
    %4 = vector.extract_strided_slice %2 {offsets = [32, 0], sizes = [32, 128], strides = [1, 1]} : vector<128x128xf32> to vector<32x128xf32>
    %5 = arith.maximumf %3, %4 : vector<32x128xf32>
    %6 = vector.extract_strided_slice %2 {offsets = [64, 0], sizes = [32, 128], strides = [1, 1]} : vector<128x128xf32> to vector<32x128xf32>
    %7 = vector.extract_strided_slice %2 {offsets = [96, 0], sizes = [32, 128], strides = [1, 1]} : vector<128x128xf32> to vector<32x128xf32>
    %8 = arith.maximumf %6, %7 : vector<32x128xf32>
    %9 = arith.maximumf %5, %8 : vector<32x128xf32>
    %c0_3 = arith.constant 0 : index
    %c0_4 = arith.constant 0 : index
    %10 = vector.load %arg3[%c0_3, %c0_4] : memref<1x128xf32, #tpu.memory_space<vmem>>, vector<1x128xf32>
    %11 = vector.broadcast %10 : vector<1x128xf32> to vector<32x128xf32>
    %12 = arith.addf %9, %11 : vector<32x128xf32>
    %cst_5 = arith.constant 0.000000e+00 : f32
    %13 = vector.broadcast %cst_5 : f32 to vector<32x128xf32>
    %14 = arith.maximumf %12, %13 : vector<32x128xf32>
    %15 = arith.truncf %14 : vector<32x128xf32> to vector<32x128xbf16>
    %c0_6 = arith.constant 0 : index
    %c0_7 = arith.constant 0 : index
    %16 = vector.load %arg4[%c0_6, %c0_7] : memref<32x128xbf16, #tpu.memory_space<vmem>>, vector<32x128xbf16>
    tpu.vector_store %arg4[%c0_6, %c0_7], %15 {strides = array<i32>} : memref<32x128xbf16, #tpu.memory_space<vmem>>, vector<32x128xbf16>,
    return
  }
  func.func @transform_0(%arg0: i32) -> (i32, i32) {
    %c0_i32 = arith.constant 0 : i32
    %c0_i32_0 = arith.constant 0 : i32
    return %arg0, %c0_i32 : i32, i32
  }
  func.func @transform_1(%arg0: i32) -> (i32, i32) {
    %c0_i32 = arith.constant 0 : i32
    %c0_i32_0 = arith.constant 0 : i32
    %c0_i32_1 = arith.constant 0 : i32
    return %c0_i32, %c0_i32_0 : i32, i32
  }
  func.func @transform_2(%arg0: i32) -> (i32, i32) {
    %c0_i32 = arith.constant 0 : i32
    %c0_i32_0 = arith.constant 0 : i32
    %c0_i32_1 = arith.constant 0 : i32
    return %c0_i32, %c0_i32_0 : i32, i32
  }
  func.func @transform_3(%arg0: i32) -> (i32, i32) {
    %c0_i32 = arith.constant 0 : i32
    %c0_i32_0 = arith.constant 0 : i32
    return %arg0, %c0_i32 : i32, i32
  }
}

module attributes {stable_mosaic.version = 11 : i64} {
  func.func @_mlp_logsoftmax_kernel(%arg0: i32, %arg1: memref<8x2048xbf16, #tpu.memory_space<vmem>>, %arg2: memref<2048x128xbf16, #tpu.memory_space<vmem>>, %arg3: memref<1x128xf32, #tpu.memory_space<vmem>>, %arg4: memref<128x128xbf16, #tpu.memory_space<vmem>>, %arg5: memref<1x128xf32, #tpu.memory_space<vmem>>, %arg6: memref<8x128xf32, #tpu.memory_space<vmem>>) attributes {dimension_semantics = [#tpu.dimension_semantics<parallel>], iteration_bounds = array<i64: 1>, scalar_prefetch = 0 : i64, scratch_operands = 0 : i64, tpu.core_type = #tpu.core_type<tc>, window_params = [{transform_indices = @transform_0, window_bounds = array<i64: 8, 2048>}, {pipeline_mode = #tpu.pipeline_mode<synchronous>, transform_indices = @transform_1, window_bounds = array<i64: 2048, 128>}, {pipeline_mode = #tpu.pipeline_mode<synchronous>, transform_indices = @transform_2, window_bounds = array<i64: 1, 128>}, {pipeline_mode = #tpu.pipeline_mode<synchronous>, transform_indices = @transform_3, window_bounds = array<i64: 128, 128>}, {pipeline_mode = #tpu.pipeline_mode<synchronous>, transform_indices = @transform_4, window_bounds = array<i64: 1, 128>}, {transform_indices = @transform_5, window_bounds = array<i64: 8, 128>}]} {
    %c0 = arith.constant 0 : index
    %c0_0 = arith.constant 0 : index
    %0 = vector.load %arg1[%c0, %c0_0] : memref<8x2048xbf16, #tpu.memory_space<vmem>>, vector<8x2048xbf16>
    %c0_1 = arith.constant 0 : index
    %c0_2 = arith.constant 0 : index
    %1 = vector.load %arg2[%c0_1, %c0_2] : memref<2048x128xbf16, #tpu.memory_space<vmem>>, vector<2048x128xbf16>
    %cst = arith.constant dense<0.000000e+00> : vector<8x128xf32>
    %2 = tpu.matmul %0, %1, %cst {dimension_numbers = #tpu.dot_dimension_numbers<[1], [0], [0], [1], [0, 0, 1, 1], [], []>} : vector<8x2048xbf16>, vector<2048x128xbf16>, vector<8x128xf32> -> vector<8x128xf32>
    %c0_3 = arith.constant 0 : index
    %c0_4 = arith.constant 0 : index
    %3 = vector.load %arg3[%c0_3, %c0_4] : memref<1x128xf32, #tpu.memory_space<vmem>>, vector<1x128xf32>
    %4 = vector.broadcast %3 : vector<1x128xf32> to vector<8x128xf32>
    %5 = arith.addf %2, %4 : vector<8x128xf32>
    %cst_5 = arith.constant 0.000000e+00 : f32
    %6 = vector.broadcast %cst_5 : f32 to vector<8x128xf32>
    %7 = arith.maximumf %5, %6 : vector<8x128xf32>
    %8 = arith.truncf %7 : vector<8x128xf32> to vector<8x128xbf16>
    %c0_6 = arith.constant 0 : index
    %c0_7 = arith.constant 0 : index
    %9 = vector.load %arg4[%c0_6, %c0_7] : memref<128x128xbf16, #tpu.memory_space<vmem>>, vector<128x128xbf16>
    %cst_8 = arith.constant dense<0.000000e+00> : vector<8x128xf32>
    %10 = tpu.matmul %8, %9, %cst_8 {dimension_numbers = #tpu.dot_dimension_numbers<[1], [0], [0], [1], [0, 0, 1, 1], [], []>} : vector<8x128xbf16>, vector<128x128xbf16>, vector<8x128xf32> -> vector<8x128xf32>
    %c0_9 = arith.constant 0 : index
    %c0_10 = arith.constant 0 : index
    %11 = vector.load %arg5[%c0_9, %c0_10] : memref<1x128xf32, #tpu.memory_space<vmem>>, vector<1x128xf32>
    %12 = vector.broadcast %11 : vector<1x128xf32> to vector<8x128xf32>
    %13 = arith.addf %10, %12 : vector<8x128xf32>
    %cst_11 = arith.constant dense<0xFF800000> : vector<8xf32>
    %14 = vector.multi_reduction <maximumf>, %13, %cst_11 [1] : vector<8x128xf32> to vector<8xf32>
    %15 = vector.shape_cast %14 : vector<8xf32> to vector<8x1xf32>
    %16 = vector.broadcast %15 : vector<8x1xf32> to vector<8x128xf32>
    %17 = arith.subf %13, %16 : vector<8x128xf32>
    %18 = math.exp %17 : vector<8x128xf32>
    %cst_12 = arith.constant dense<0.000000e+00> : vector<8xf32>
    %19 = vector.multi_reduction <add>, %18, %cst_12 [1] : vector<8x128xf32> to vector<8xf32>
    %20 = vector.shape_cast %19 : vector<8xf32> to vector<8x1xf32>
    %21 = math.log %20 : vector<8x1xf32>
    %22 = arith.addf %15, %21 : vector<8x1xf32>
    %23 = vector.broadcast %22 : vector<8x1xf32> to vector<8x128xf32>
    %24 = arith.subf %13, %23 : vector<8x128xf32>
    %c0_13 = arith.constant 0 : index
    %c0_14 = arith.constant 0 : index
    %25 = vector.load %arg6[%c0_13, %c0_14] : memref<8x128xf32, #tpu.memory_space<vmem>>, vector<8x128xf32>
    tpu.vector_store %arg6[%c0_13, %c0_14], %24 {strides = array<i32>} : memref<8x128xf32, #tpu.memory_space<vmem>>, vector<8x128xf32>,
    return
  }
  func.func @transform_0(%arg0: i32) -> (i32, i32) {
    %c0_i32 = arith.constant 0 : i32
    %c0_i32_0 = arith.constant 0 : i32
    return %arg0, %c0_i32 : i32, i32
  }
  func.func @transform_1(%arg0: i32) -> (i32, i32) {
    %c0_i32 = arith.constant 0 : i32
    %c0_i32_0 = arith.constant 0 : i32
    %c0_i32_1 = arith.constant 0 : i32
    return %c0_i32, %c0_i32_0 : i32, i32
  }
  func.func @transform_2(%arg0: i32) -> (i32, i32) {
    %c0_i32 = arith.constant 0 : i32
    %c0_i32_0 = arith.constant 0 : i32
    %c0_i32_1 = arith.constant 0 : i32
    return %c0_i32, %c0_i32_0 : i32, i32
  }
  func.func @transform_3(%arg0: i32) -> (i32, i32) {
    %c0_i32 = arith.constant 0 : i32
    %c0_i32_0 = arith.constant 0 : i32
    %c0_i32_1 = arith.constant 0 : i32
    return %c0_i32, %c0_i32_0 : i32, i32
  }
  func.func @transform_4(%arg0: i32) -> (i32, i32) {
    %c0_i32 = arith.constant 0 : i32
    %c0_i32_0 = arith.constant 0 : i32
    %c0_i32_1 = arith.constant 0 : i32
    return %c0_i32, %c0_i32_0 : i32, i32
  }
  func.func @transform_5(%arg0: i32) -> (i32, i32) {
    %c0_i32 = arith.constant 0 : i32
    %c0_i32_0 = arith.constant 0 : i32
    return %arg0, %c0_i32 : i32, i32
  }
}

</mosaic_0001>

<bundles_post_ra>
// kernel: net_forward.3
= control target key start
LH: loop header
LB: loop body
LE: loop exit
PB: predicated region body
PF: predicated region fallthrough
CT: control target
= control target key end

     0   :  { %vm751_vm0 = vcmask 1043456   ;;  %vm752_vm1 = vcmask 1044480   ;;  %v2365_v1 = vmov 65535   ;;  %vm534_vm2 = vcmask 203776   ;;  %s2991_s1 = inlined_call_operand.vmem [shape: bf16[25,128], index: 1, kind: input, shape index: {}]   ;;  %s2992_s0 = inlined_call_operand.vmem [shape: bf16[1152,25], index: 0, kind: input, shape index: {}]   ;;  %s2993_s2 = inlined_call_operand.vmem [shape: f32[1,128], index: 2, kind: input, shape index: {}]   ;;  %s2994_s3 = inlined_call_operand.vmem [shape: bf16[288,128], index: 3, kind: output, shape index: {}]  }
   0x1   :  { %v2291_v0 = vld [vmem:[%s2991_s1 + $0x8] sm:$0x1f]   ;;  %v753_v2 = vsel %vm751_vm0, 4294967295, %v2365_v1  ;;  %v2293_v4 = vld [vmem:[%s2992_s0] sm:$0xff]   ;;  %v2297_v10 = vld [vmem:[%s2992_s0 + $0x10] sm:$0xff]  }
   0x2   :  { %v754_v3 = vsel %vm752_vm1, %v753_v2, 0  ;;  %v2292_v6 = vld [vmem:[%s2991_s1] sm:$0xff]   ;;  %2142 = vmatprep.mubr.msk.bf16.mxu0 %vm534_vm2, %v2293_v4  ;;  %v2295_v8 = vld [vmem:[%s2992_s0 + $0x8] sm:$0xff]   ;;  %v2298_v11 = vld [vmem:[%s2992_s0 + $0x130] sm:$0xff]  }
   0x3   :  { %v756_v5 = vand.u32 %v2291_v0, %v754_v3  ;;  %v2294_v7 = vld [vmem:[%s2992_s0 + $0x120] sm:$0xff]   ;;  %v2296_v9 = vld [vmem:[%s2992_s0 + $0x128] sm:$0xff]   ;;  %v2299_v12 = vld [vmem:[%s2992_s0 + $0x18] sm:$0xff]  }
   0x4   :  { %2214 = vmatprep.mubr.msk.bf16.mxu1 %vm534_vm2, %v2294_v7  ;;  %v2300_v13 = vld [vmem:[%s2992_s0 + $0x138] sm:$0xff]   ;;  %v2301_v14 = vld [vmem:[%s2992_s0 + $0x20] sm:$0xff]   ;;  %v2303_v16 = vld [vmem:[%s2992_s0 + $0x28] sm:$0xff]  }
   0x5   :  { %2138 = vmatprep.subr.bf16.mxu0 %v756_v5  ;;  %2286 = vmatprep.subr.bf16.mxu1 %v756_v5  ;;  %v2302_v15 = vld [vmem:[%s2992_s0 + $0x140] sm:$0xff]   ;;  %v2304_v17 = vld [vmem:[%s2992_s0 + $0x148] sm:$0xff]   ;;  %v2305_v18 = vld [vmem:[%s2992_s0 + $0x30] sm:$0xff]  }
   0x6   :  { %2139 = vmatpush3.bf16.msra.mxu0 %v756_v5  ;;  %2288 = vmatpush3.bf16.msra.mxu1 %v756_v5  ;;  %v2306_v19 = vld [vmem:[%s2992_s0 + $0x150] sm:$0xff]   ;;  %v2307_v20 = vld [vmem:[%s2992_s0 + $0x38] sm:$0xff]   ;;  %v2309_v22 = vld [vmem:[%s2992_s0 + $0x40] sm:$0xff]  }
   0x7   :  { %2140 = vmatprep.subr.bf16.mxu0 %v2292_v6  ;;  %2287 = vmatprep.subr.bf16.mxu1 %v2292_v6  ;;  %v2308_v21 = vld [vmem:[%s2992_s0 + $0x158] sm:$0xff]   ;;  %v2310_v23 = vld [vmem:[%s2992_s0 + $0x160] sm:$0xff]   ;;  %v2311_v24 = vld [vmem:[%s2992_s0 + $0x48] sm:$0xff]  }
   0x8   :  { %v2312_v25 = vld [vmem:[%s2992_s0 + $0x168] sm:$0xff]   ;;  %v2313_v26 = vld [vmem:[%s2992_s0 + $0x50] sm:$0xff]   ;;  %v2315_v28 = vld [vmem:[%s2992_s0 + $0x58] sm:$0xff]  }
   0x9   :  { %v2314_v27 = vld [vmem:[%s2992_s0 + $0x170] sm:$0xff]   ;;  %v2316_v29 = vld [vmem:[%s2992_s0 + $0x178] sm:$0xff]   ;;  %v2317_v30 = vld [vmem:[%s2992_s0 + $0x60] sm:$0xff]  }
   0xa   :  { %2141 = vmatpush3.bf16.msra.mxu0 %v2292_v6  ;;  %2289 = vmatpush3.bf16.msra.mxu1 %v2292_v6  ;;  %v2318_v31 = vld [vmem:[%s2992_s0 + $0x180] sm:$0xff]   ;;  %v2319_v32 = vld [vmem:[%s2992_s0 + $0x68] sm:$0xff]   ;;  %v2321_v34 = vld [vmem:[%s2992_s0 + $0x70] sm:$0xff]  }
   0xb   :  { %v2320_v33 = vld [vmem:[%s2992_s0 + $0x188] sm:$0xff]   ;;  %v2322_v35 = vld [vmem:[%s2992_s0 + $0x190] sm:$0xff]   ;;  %v2323_v36 = vld [vmem:[%s2992_s0 + $0x78] sm:$0xff]  }
   0xc   :  { %v2324_v37 = vld [vmem:[%s2992_s0 + $0x198] sm:$0xff]   ;;  %v2325_v38 = vld [vmem:[%s2992_s0 + $0x80] sm:$0xff]   ;;  %v2327_v40 = vld [vmem:[%s2992_s0 + $0x88] sm:$0xff]  }
   0xd   :  { %2143 = vmatmul.mubr.msk.bf16.vlgmr.msra.gmra.mxu0 %vm534_vm2, %v2295_v8  ;;  %2215 = vmatmul.mubr.msk.bf16.vlgmr.msra.gmra.mxu1 %vm534_vm2, %v2296_v9  ;;  %v2326_v39 = vld [vmem:[%s2992_s0 + $0x1a0] sm:$0xff]   ;;  %v2328_v41 = vld [vmem:[%s2992_s0 + $0x1a8] sm:$0xff]   ;;  %v2329_v42 = vld [vmem:[%s2992_s0 + $0x90] sm:$0xff]  }
   0xe   :  { %2146 = vmatprep.mubr.msk.bf16.mxu0 %vm534_vm2, %v2297_v10  ;;  %2218 = vmatprep.mubr.msk.bf16.mxu1 %vm534_vm2, %v2298_v11  ;;  %v2330_v43 = vld [vmem:[%s2992_s0 + $0x1b0] sm:$0xff]   ;;  %v2331_v44 = vld [vmem:[%s2992_s0 + $0x98] sm:$0xff]   ;;  %v2333_v46 = vld [vmem:[%s2992_s0 + $0xa0] sm:$0xff]  }
   0xf   :  { %v2332_v45 = vld [vmem:[%s2992_s0 + $0x1b8] sm:$0xff]   ;;  %v2334_v47 = vld [vmem:[%s2992_s0 + $0x1c0] sm:$0xff]   ;;  %v2335_v48 = vld [vmem:[%s2992_s0 + $0xa8] sm:$0xff]  }
  0x10   :  { %v2336_v49 = vld [vmem:[%s2992_s0 + $0x1c8] sm:$0xff]   ;;  %v2337_v50 = vld [vmem:[%s2992_s0 + $0xb0] sm:$0xff]   ;;  %v2339_v52 = vld [vmem:[%s2992_s0 + $0xb8] sm:$0xff]  }
  0x11   :  { %v2338_v51 = vld [vmem:[%s2992_s0 + $0x1d0] sm:$0xff]   ;;  %v2340_v53 = vld [vmem:[%s2992_s0 + $0x1d8] sm:$0xff]   ;;  %v2341_v54 = vld [vmem:[%s2992_s0 + $0xc0] sm:$0xff]  }
  0x12   :  { %v2342_v55 = vld [vmem:[%s2992_s0 + $0x1e0] sm:$0xff]   ;;  %v2343_v56 = vld [vmem:[%s2992_s0 + $0xc8] sm:$0xff]   ;;  %v2345_v58 = vld [vmem:[%s2992_s0 + $0xd0] sm:$0xff]  }
  0x13   :  { %v2344_v57 = vld [vmem:[%s2992_s0 + $0x1e8] sm:$0xff]   ;;  %v2346_v59 = vld [vmem:[%s2992_s0 + $0x1f0] sm:$0xff]   ;;  %v2347_v60 = vld [vmem:[%s2992_s0 + $0xd8] sm:$0xff]  }
  0x14   :  { %v2348_v61 = vld [vmem:[%s2992_s0 + $0x1f8] sm:$0xff]   ;;  %v2349_v62 = vld [vmem:[%s2992_s0 + $0xe0] sm:$0xff]   ;;  %v2351_v0 = vld [vmem:[%s2992_s0 + $0xe8] sm:$0xff]  }
  0x15   :  { %2147 = vmatmul.mubr.msk.bf16.gmra.mxu0 %vm534_vm2, %v2299_v12  ;;  %2219 = vmatmul.mubr.msk.bf16.gmra.mxu1 %vm534_vm2, %v2300_v13  ;;  %v2350_v63 = vld [vmem:[%s2992_s0 + $0x200] sm:$0xff]   ;;  %v2352_v1 = vld [vmem:[%s2992_s0 + $0x208] sm:$0xff]   ;;  %v2353_v2 = vld [vmem:[%s2992_s0 + $0xf0] sm:$0xff]  }
  0x16   :  { %2150 = vmatprep.mubr.msk.bf16.mxu0 %vm534_vm2, %v2301_v14  ;;  %2222 = vmatprep.mubr.msk.bf16.mxu1 %vm534_vm2, %v2302_v15  ;;  %v2354_v3 = vld [vmem:[%s2992_s0 + $0x210] sm:$0xff]   ;;  %v2355_v4 = vld [vmem:[%s2992_s0 + $0xf8] sm:$0xff]   ;;  %v2357_v6 = vld [vmem:[%s2992_s0 + $0x100] sm:$0xff]  }
  0x17   :  { %v2356_v5 = vld [vmem:[%s2992_s0 + $0x218] sm:$0xff]   ;;  %v2358_v7 = vld [vmem:[%s2992_s0 + $0x220] sm:$0xff]   ;;  %v2359_v8 = vld [vmem:[%s2992_s0 + $0x108] sm:$0xff]  }
  0x18   :  { %v2360_v9 = vld [vmem:[%s2992_s0 + $0x228] sm:$0xff]   ;;  %v2361_v10 = vld [vmem:[%s2992_s0 + $0x110] sm:$0xff]   ;;  %v2363_v12 = vld [vmem:[%s2992_s0 + $0x118] sm:$0xff]  }
  0x19   :  { %v2362_v11 = vld [vmem:[%s2992_s0 + $0x230] sm:$0xff]   ;;  %v2364_v13 = vld [vmem:[%s2992_s0 + $0x238] sm:$0xff]  }
  0x1d   :  { %2151 = vmatmul.mubr.msk.bf16.gmra.mxu0 %vm534_vm2, %v2303_v16  ;;  %2223 = vmatmul.mubr.msk.bf16.gmra.mxu1 %vm534_vm2, %v2304_v17 }
  0x1e   :  { %2154 = vmatprep.mubr.msk.bf16.mxu0 %vm534_vm2, %v2305_v18  ;;  %2226 = vmatprep.mubr.msk.bf16.mxu1 %vm534_vm2, %v2306_v19 }
  0x25   :  { %2155 = vmatmul.mubr.msk.bf16.gmra.mxu0 %vm534_vm2, %v2307_v20  ;;  %2227 = vmatmul.mubr.msk.bf16.gmra.mxu1 %vm534_vm2, %v2308_v21 }
  0x26   :  { %2158 = vmatprep.mubr.msk.bf16.mxu0 %vm534_vm2, %v2309_v22  ;;  %2230 = vmatprep.mubr.msk.bf16.mxu1 %vm534_vm2, %v2310_v23 }
  0x2d   :  { %2159 = vmatmul.mubr.msk.bf16.gmra.mxu0 %vm534_vm2, %v2311_v24  ;;  %2231 = vmatmul.mubr.msk.bf16.gmra.mxu1 %vm534_vm2, %v2312_v25 }
  0x2e   :  { %2162 = vmatprep.mubr.msk.bf16.mxu0 %vm534_vm2, %v2313_v26  ;;  %2234 = vmatprep.mubr.msk.bf16.mxu1 %vm534_vm2, %v2314_v27 }
  0x35   :  { %2163 = vmatmul.mubr.msk.bf16.gmra.mxu0 %vm534_vm2, %v2315_v28  ;;  %2235 = vmatmul.mubr.msk.bf16.gmra.mxu1 %vm534_vm2, %v2316_v29 }
  0x36   :  { %2166 = vmatprep.mubr.msk.bf16.mxu0 %vm534_vm2, %v2317_v30  ;;  %2238 = vmatprep.mubr.msk.bf16.mxu1 %vm534_vm2, %v2318_v31 }
  0x3d   :  { %2167 = vmatmul.mubr.msk.bf16.gmra.mxu0 %vm534_vm2, %v2319_v32  ;;  %2239 = vmatmul.mubr.msk.bf16.gmra.mxu1 %vm534_vm2, %v2320_v33 }
  0x3e   :  { %2170 = vmatprep.mubr.msk.bf16.mxu0 %vm534_vm2, %v2321_v34  ;;  %2242 = vmatprep.mubr.msk.bf16.mxu1 %vm534_vm2, %v2322_v35 }
  0x45   :  { %2171 = vmatmul.mubr.msk.bf16.gmra.mxu0 %vm534_vm2, %v2323_v36  ;;  %2243 = vmatmul.mubr.msk.bf16.gmra.mxu1 %vm534_vm2, %v2324_v37 }
  0x46   :  { %2174 = vmatprep.mubr.msk.bf16.mxu0 %vm534_vm2, %v2325_v38  ;;  %2246 = vmatprep.mubr.msk.bf16.mxu1 %vm534_vm2, %v2326_v39 }
  0x4d   :  { %2175 = vmatmul.mubr.msk.bf16.gmra.mxu0 %vm534_vm2, %v2327_v40  ;;  %2247 = vmatmul.mubr.msk.bf16.gmra.mxu1 %vm534_vm2, %v2328_v41 }
  0x4e   :  { %2178 = vmatprep.mubr.msk.bf16.mxu0 %vm534_vm2, %v2329_v42  ;;  %2250 = vmatprep.mubr.msk.bf16.mxu1 %vm534_vm2, %v2330_v43 }
  0x55   :  { %2179 = vmatmul.mubr.msk.bf16.gmra.mxu0 %vm534_vm2, %v2331_v44  ;;  %2251 = vmatmul.mubr.msk.bf16.gmra.mxu1 %vm534_vm2, %v2332_v45 }
  0x56   :  { %2182 = vmatprep.mubr.msk.bf16.mxu0 %vm534_vm2, %v2333_v46  ;;  %2254 = vmatprep.mubr.msk.bf16.mxu1 %vm534_vm2, %v2334_v47 }
  0x5d   :  { %2183 = vmatmul.mubr.msk.bf16.gmra.mxu0 %vm534_vm2, %v2335_v48  ;;  %2255 = vmatmul.mubr.msk.bf16.gmra.mxu1 %vm534_vm2, %v2336_v49 }
  0x5e   :  { %2186 = vmatprep.mubr.msk.bf16.mxu0 %vm534_vm2, %v2337_v50  ;;  %2258 = vmatprep.mubr.msk.bf16.mxu1 %vm534_vm2, %v2338_v51 }
  0x65   :  { %2187 = vmatmul.mubr.msk.bf16.gmra.mxu0 %vm534_vm2, %v2339_v52  ;;  %2259 = vmatmul.mubr.msk.bf16.gmra.mxu1 %vm534_vm2, %v2340_v53 }
  0x66   :  { %2190 = vmatprep.mubr.msk.bf16.mxu0 %vm534_vm2, %v2341_v54  ;;  %2262 = vmatprep.mubr.msk.bf16.mxu1 %vm534_vm2, %v2342_v55 }
  0x6d   :  { %2191 = vmatmul.mubr.msk.bf16.gmra.mxu0 %vm534_vm2, %v2343_v56  ;;  %2263 = vmatmul.mubr.msk.bf16.gmra.mxu1 %vm534_vm2, %v2344_v57 }
  0x6e   :  { %2194 = vmatprep.mubr.msk.bf16.mxu0 %vm534_vm2, %v2345_v58  ;;  %2266 = vmatprep.mubr.msk.bf16.mxu1 %vm534_vm2, %v2346_v59 }
  0x75   :  { %2195 = vmatmul.mubr.msk.bf16.gmra.mxu0 %vm534_vm2, %v2347_v60  ;;  %2267 = vmatmul.mubr.msk.bf16.gmra.mxu1 %vm534_vm2, %v2348_v61 }
  0x76   :  { %2198 = vmatprep.mubr.msk.bf16.mxu0 %vm534_vm2, %v2349_v62  ;;  %2270 = vmatprep.mubr.msk.bf16.mxu1 %vm534_vm2, %v2350_v63 }
  0x7d   :  { %2199 = vmatmul.mubr.msk.bf16.gmra.mxu0 %vm534_vm2, %v2351_v0  ;;  %2271 = vmatmul.mubr.msk.bf16.gmra.mxu1 %vm534_vm2, %v2352_v1 }
  0x7e   :  { %2202 = vmatprep.mubr.msk.bf16.mxu0 %vm534_vm2, %v2353_v2  ;;  %2274 = vmatprep.mubr.msk.bf16.mxu1 %vm534_vm2, %v2354_v3 }
  0x85   :  { %2203 = vmatmul.mubr.msk.bf16.gmra.mxu0 %vm534_vm2, %v2355_v4  ;;  %2275 = vmatmul.mubr.msk.bf16.gmra.mxu1 %vm534_vm2, %v2356_v5 }
  0x86   :  { %2206 = vmatprep.mubr.msk.bf16.mxu0 %vm534_vm2, %v2357_v6  ;;  %2278 = vmatprep.mubr.msk.bf16.mxu1 %vm534_vm2, %v2358_v7 }
  0x8d   :  { %2207 = vmatmul.mubr.msk.bf16.gmra.mxu0 %vm534_vm2, %v2359_v8  ;;  %2279 = vmatmul.mubr.msk.bf16.gmra.mxu1 %vm534_vm2, %v2360_v9 }
  0x8e   :  { %2210 = vmatprep.mubr.msk.bf16.mxu0 %vm534_vm2, %v2361_v10  ;;  %2282 = vmatprep.mubr.msk.bf16.mxu1 %vm534_vm2, %v2362_v11 }
  0x95   :  { %2211 = vmatmul.mubr.msk.bf16.gmra.mxu0 %vm534_vm2, %v2363_v12  ;;  %2283 = vmatmul.mubr.msk.bf16.gmra.mxu1 %vm534_vm2, %v2364_v13 }
  0xcd   :  { %v2680_v14 = vpop.f32.mrf.mxu0  ;;  %v2682_v15 = vpop.f32.mrf.mxu1 }
  0xcf   :  { %v2684_v16 = vpop.f32.mrf.mxu0  ;;  %v2686_v17 = vpop.f32.mrf.mxu1 }
  0xd1   :  { %v2688_v18 = vpop.f32.mrf.mxu0  ;;  %v2690_v19 = vpop.f32.mrf.mxu1 }
  0xd3   :  { %v2692_v20 = vpop.f32.mrf.mxu0  ;;  %v2694_v21 = vpop.f32.mrf.mxu1 }
  0xd5   :  { %v2696_v22 = vpop.f32.mrf.mxu0  ;;  %v2698_v23 = vpop.f32.mrf.mxu1 }
  0xd7   :  { %v2700_v24 = vpop.f32.mrf.mxu0  ;;  %v2702_v25 = vpop.f32.mrf.mxu1 }
  0xd9   :  { %v2704_v26 = vpop.f32.mrf.mxu0  ;;  %v2706_v27 = vpop.f32.mrf.mxu1 }
  0xdb   :  { %v2708_v28 = vpop.f32.mrf.mxu0  ;;  %v2710_v29 = vpop.f32.mrf.mxu1 }
  0xdd   :  { %v2712_v30 = vpop.f32.mrf.mxu0  ;;  %v2714_v31 = vpop.f32.mrf.mxu1 }
  0xdf   :  { %v2716_v32 = vpop.f32.mrf.mxu0  ;;  %v2718_v33 = vpop.f32.mrf.mxu1 }
  0xe1   :  { %v2720_v34 = vpop.f32.mrf.mxu0  ;;  %v2722_v35 = vpop.f32.mrf.mxu1 }
  0xe3   :  { %v2724_v36 = vpop.f32.mrf.mxu0  ;;  %v2726_v37 = vpop.f32.mrf.mxu1 }
  0xe5   :  { %v2728_v38 = vpop.f32.mrf.mxu0  ;;  %v2730_v39 = vpop.f32.mrf.mxu1 }
  0xe7   :  { %v2732_v40 = vpop.f32.mrf.mxu0  ;;  %v2734_v41 = vpop.f32.mrf.mxu1 }
  0xe9   :  { %v2736_v42 = vpop.f32.mrf.mxu0  ;;  %v2738_v43 = vpop.f32.mrf.mxu1 }
  0xeb   :  { %v2740_v44 = vpop.f32.mrf.mxu0  ;;  %v2742_v45 = vpop.f32.mrf.mxu1 }
  0xed   :  { %v2744_v46 = vpop.f32.mrf.mxu0  ;;  %v2746_v47 = vpop.f32.mrf.mxu1 }
  0xef   :  { %v2748_v48 = vpop.f32.mrf.mxu0  ;;  %v2750_v49 = vpop.f32.mrf.mxu1 }
  0xf1   :  { %v2752_v50 = vpop.f32.mrf.mxu0  ;;  %v2754_v51 = vpop.f32.mrf.mxu1 }
  0xf3   :  { %v2756_v52 = vpop.f32.mrf.mxu0  ;;  %v2758_v53 = vpop.f32.mrf.mxu1 }
  0xf5   :  { %v2760_v54 = vpop.f32.mrf.mxu0  ;;  %v2762_v55 = vpop.f32.mrf.mxu1 }
  0xf7   :  { %v2764_v56 = vpop.f32.mrf.mxu0  ;;  %v2766_v57 = vpop.f32.mrf.mxu1 }
  0xf9   :  { %v2768_v58 = vpop.f32.mrf.mxu0  ;;  %v2770_v59 = vpop.f32.mrf.mxu1 }
  0xfb   :  { %v2772_v60 = vpop.f32.mrf.mxu0  ;;  %v2774_v61 = vpop.f32.mrf.mxu1 }
  0xfd   :  { %v2776_v62 = vpop.f32.mrf.mxu0  ;;  %v2778_v63 = vpop.f32.mrf.mxu1 }
  0xfe   :  { %2995 = vst [vmem:[#allocation2_spill] sm:$0xff] %v2778_v63 }
  0xff   :  { %v2780_v0 = vpop.f32.mrf.mxu0  ;;  %v2782_v1 = vpop.f32.mrf.mxu1 }
 0x100   :  { %2996 = vst [vmem:[#allocation3_spill] sm:$0xff] %v2780_v0  ;;  %2997 = vst [vmem:[#allocation4_spill] sm:$0xff] %v2782_v1 }
 0x101   :  { %v2784_v2 = vpop.f32.mrf.mxu0  ;;  %v2786_v3 = vpop.f32.mrf.mxu1 }
 0x102   :  { %2998 = vst [vmem:[#allocation5_spill] sm:$0xff] %v2784_v2  ;;  %2999 = vst [vmem:[#allocation6_spill] sm:$0xff] %v2786_v3 }
 0x103   :  { %v2788_v4 = vpop.f32.mrf.mxu0  ;;  %v2790_v5 = vpop.f32.mrf.mxu1 }
 0x104   :  { %3000 = vst [vmem:[#allocation7_spill] sm:$0xff] %v2788_v4  ;;  %3001 = vst [vmem:[#allocation8_spill] sm:$0xff] %v2790_v5 }
 0x105   :  { %v2792_v6 = vpop.f32.mrf.mxu0  ;;  %v2794_v7 = vpop.f32.mrf.mxu1 }
 0x106   :  { %3002 = vst [vmem:[#allocation9_spill] sm:$0xff] %v2792_v6  ;;  %3003 = vst [vmem:[#allocation10_spill] sm:$0xff] %v2794_v7 }
 0x107   :  { %v2796_v8 = vpop.f32.mrf.mxu0  ;;  %v2798_v9 = vpop.f32.mrf.mxu1 }
 0x108   :  { %3004 = vst [vmem:[#allocation11_spill] sm:$0xff] %v2796_v8  ;;  %3005 = vst [vmem:[#allocation12_spill] sm:$0xff] %v2798_v9 }
 0x109   :  { %v2800_v10 = vpop.f32.mrf.mxu0  ;;  %v2802_v11 = vpop.f32.mrf.mxu1 }
 0x10a   :  { %3006 = vst [vmem:[#allocation13_spill] sm:$0xff] %v2800_v10  ;;  %3007 = vst [vmem:[#allocation14_spill] sm:$0xff] %v2802_v11 }
 0x10b   :  { %v2804_v12 = vpop.f32.mrf.mxu0  ;;  %v2806_v13 = vpop.f32.mrf.mxu1 }
 0x10c   :  { %3008 = vst [vmem:[#allocation15_spill] sm:$0xff] %v2804_v12  ;;  %3009 = vst [vmem:[#allocation16_spill] sm:$0xff] %v2806_v13 }
 0x10d   :  { %v2808_v3 = vpop.f32.mrf.mxu0  ;;  %v2810_v4 = vpop.f32.mrf.mxu1 }
 0x10e   :  { %3010 = vst [vmem:[#allocation17_spill] sm:$0xff] %v2808_v3  ;;  %3011 = vst [vmem:[#allocation18_spill] sm:$0xff] %v2810_v4 }
 0x10f   :  { %v2812_v5 = vpop.f32.mrf.mxu0  ;;  %v2814_v6 = vpop.f32.mrf.mxu1 }
 0x110   :  { %3012 = vst [vmem:[#allocation19_spill] sm:$0xff] %v2812_v5  ;;  %3013 = vst [vmem:[#allocation20_spill] sm:$0xff] %v2814_v6 }
 0x111   :  { %v2816_v7 = vpop.f32.mrf.mxu0  ;;  %v2818_v8 = vpop.f32.mrf.mxu1 }
 0x112   :  { %3014 = vst [vmem:[#allocation21_spill] sm:$0xff] %v2816_v7  ;;  %3015 = vst [vmem:[#allocation22_spill] sm:$0xff] %v2818_v8  ;;  %v2831_v8 = vld [vmem:[%s2993_s2] ss:$0 sm:$0xff] }
 0x113   :  { %v2820_v9 = vpop.f32.mrf.mxu0  ;;  %v2822_v10 = vpop.f32.mrf.mxu1 }
 0x114   :  { %3016 = vst [vmem:[#allocation23_spill] sm:$0xff] %v2820_v9  ;;  %3017 = vst [vmem:[#allocation24_spill] sm:$0xff] %v2822_v10 }
 0x115   :  { %v2180_v11 = vpop.f32.mrf.mxu0  ;;  %v2252_v12 = vpop.f32.mrf.mxu1 }
 0x116   :  { %v1369_v13 = vmax.f32 %v2680_v14, %v2180_v11  ;;  %v1405_v3 = vmax.f32 %v2682_v15, %v2252_v12 }
 0x117   :  { %v936_v2 = vpop.f32.mrf.mxu0  ;;  %v1224_v4 = vpop.f32.mrf.mxu1 }
 0x118   :  { %v1441_v1 = vmax.f32 %v1369_v13, %v1405_v3  ;;  %v1367_v5 = vmax.f32 %v2684_v16, %v936_v2  ;;  %v1403_v6 = vmax.f32 %v2686_v17, %v1224_v4 }
 0x119   :  { %v2181_v9 = vpop.f32.mrf.mxu0  ;;  %v2253_v10 = vpop.f32.mrf.mxu1 }
 0x11a   :  { %v1370_v7 = vmax.f32 %v2688_v18, %v2181_v9  ;;  %v1406_v14 = vmax.f32 %v2690_v19, %v2253_v10  ;;  %v1439_v11 = vmax.f32 %v1367_v5, %v1403_v6  ;;  %v1484_v3 = vadd.f32 %v2831_v8, %v1441_v1 }
 0x11b   :  { %v939_v15 = vpop.f32.mrf.mxu0  ;;  %v1227_v12 = vpop.f32.mrf.mxu1 }
 0x11c   :  { %v1442_v13 = vmax.f32 %v1370_v7, %v1406_v14  ;;  %v1368_v16 = vmax.f32 %v2692_v20, %v939_v15  ;;  %v1404_v17 = vmax.f32 %v2694_v21, %v1227_v12  ;;  %v1482_v19 = vadd.f32 %v2831_v8, %v1439_v11 }
 0x11d   :  { %v2184_v2 = vpop.f32.mrf.mxu0  ;;  %v2256_v4 = vpop.f32.mrf.mxu1  ;;  %v1520_v10 = vmax.f32 %v1484_v3, 0.0 }
 0x11e   :  { %v1485_v0 = vadd.f32 %v2831_v8, %v1442_v13  ;;  %v1373_v63 = vmax.f32 %v2696_v22, %v2184_v2  ;;  %v1409_v18 = vmax.f32 %v2698_v23, %v2256_v4  ;;  %v1440_v5 = vmax.f32 %v1368_v16, %v1404_v17 }
 0x11f   :  { %v952_v6 = vpop.f32.mrf.mxu0  ;;  %v1240_v9 = vpop.f32.mrf.mxu1  ;;  %v1518_v2 = vmax.f32 %v1482_v19, 0.0 }
 0x120   :  { %v1521_v1 = vmax.f32 %v1485_v0, 0.0  ;;  %v1371_v7 = vmax.f32 %v2700_v24, %v952_v6  ;;  %v1407_v20 = vmax.f32 %v2702_v25, %v1240_v9  ;;  %v1483_v21 = vadd.f32 %v2831_v8, %v1440_v5 }
 0x121   :  { %v1445_v14 = vmax.f32 %v1373_v63, %v1409_v18  ;;  %v2185_v15 = vpop.f32.mrf.mxu0  ;;  %v2257_v12 = vpop.f32.mrf.mxu1 }
 0x122   :  { %v1965_v13 = vpack.c.bf16 %v1521_v1, %v1520_v10  ;;  %v1443_v22 = vmax.f32 %v1371_v7, %v1407_v20  ;;  %v1374_v23 = vmax.f32 %v2704_v26, %v2185_v15  ;;  %v1519_v11 = vmax.f32 %v1483_v21, 0.0 }
 0x123   :  { %v1410_v16 = vmax.f32 %v2706_v27, %v2257_v12  ;;  %v955_v17 = vpop.f32.mrf.mxu0  ;;  %v1243_v3 = vpop.f32.mrf.mxu1  ;;  %v1488_v0 = vadd.f32 %v2831_v8, %v1445_v14 }
 0x124   :  { %2047 = vst [vmem:[%s2994_s3 + $0x8] sm:$0xff] %v1965_v13   ;;  %v1372_v24 = vmax.f32 %v2708_v28, %v955_v17  ;;  %v1408_v25 = vmax.f32 %v2710_v29, %v1243_v3  ;;  %v1960_v63 = vpack.c.bf16 %v1519_v11, %v1518_v2  ;;  %v1486_v19 = vadd.f32 %v2831_v8, %v1443_v22 }
 0x125   :  { %v1446_v4 = vmax.f32 %v1374_v23, %v1410_v16  ;;  %v2188_v18 = vpop.f32.mrf.mxu0  ;;  %v2260_v26 = vpop.f32.mrf.mxu1  ;;  %v1524_v20 = vmax.f32 %v1488_v0, 0.0 }
 0x126   :  { %v1444_v5 = vmax.f32 %v1372_v24, %v1408_v25  ;;  %v1377_v27 = vmax.f32 %v2712_v30, %v2188_v18  ;;  %v1413_v6 = vmax.f32 %v2714_v31, %v2260_v26  ;;  %1961 = vst [vmem:[%s2994_s3] sm:$0xff] %v1960_v63   ;;  %v1522_v31 = vmax.f32 %v1486_v19, 0.0 }
 0x127   :  { %v1489_v28 = vadd.f32 %v2831_v8, %v1446_v4  ;;  %v968_v29 = vpop.f32.mrf.mxu0  ;;  %v1256_v9 = vpop.f32.mrf.mxu1 }
 0x128   :  { %v1487_v10 = vadd.f32 %v2831_v8, %v1444_v5  ;;  %v1375_v1 = vmax.f32 %v2716_v32, %v968_v29  ;;  %v1411_v7 = vmax.f32 %v2718_v33, %v1256_v9  ;;  %v1449_v14 = vmax.f32 %v1377_v27, %v1413_v6 }
 0x129   :  { %v1525_v21 = vmax.f32 %v1489_v28, 0.0  ;;  %v2189_v30 = vpop.f32.mrf.mxu0  ;;  %v2261_v15 = vpop.f32.mrf.mxu1 }
 0x12a   :  { %v1523_v12 = vmax.f32 %v1487_v10, 0.0  ;;  %v1378_v13 = vmax.f32 %v2720_v34, %v2189_v30  ;;  %v1447_v23 = vmax.f32 %v1375_v1, %v1411_v7  ;;  %v1414_v2 = vmax.f32 %v2722_v35, %v2261_v15 }
 0x12b   :  { %v1975_v22 = vpack.c.bf16 %v1525_v21, %v1524_v20  ;;  %v971_v11 = vpop.f32.mrf.mxu0  ;;  %v1259_v16 = vpop.f32.mrf.mxu1  ;;  %v1492_v33 = vadd.f32 %v2831_v8, %v1449_v14 }
 0x12c   :  { %v1970_v17 = vpack.c.bf16 %v1523_v12, %v1522_v31  ;;  %v1376_v32 = vmax.f32 %v2724_v36, %v971_v11  ;;  %v1450_v3 = vmax.f32 %v1378_v13, %v1414_v2  ;;  %v1412_v24 = vmax.f32 %v2726_v37, %v1259_v16 }
 0x12d   :  { %2049 = vst [vmem:[%s2994_s3 + $0x18] sm:$0xff] %v1975_v22   ;;  %v2192_v25 = vpop.f32.mrf.mxu0  ;;  %v2264_v34 = vpop.f32.mrf.mxu1  ;;  %v1490_v36 = vadd.f32 %v2831_v8, %v1447_v23  ;;  %v1528_v27 = vmax.f32 %v1492_v33, 0.0 }
 0x12e   :  { %2048 = vst [vmem:[%s2994_s3 + $0x10] sm:$0xff] %v1970_v17   ;;  %v1381_v35 = vmax.f32 %v2728_v38, %v2192_v25  ;;  %v1417_v63 = vmax.f32 %v2730_v39, %v2264_v34  ;;  %v1493_v0 = vadd.f32 %v2831_v8, %v1450_v3  ;;  %v1448_v4 = vmax.f32 %v1376_v32, %v1412_v24 }
 0x12f   :  { %v984_v18 = vpop.f32.mrf.mxu0  ;;  %v1272_v26 = vpop.f32.mrf.mxu1  ;;  %v1526_v10 = vmax.f32 %v1490_v36, 0.0 }
 0x130   :  { %v1453_v19 = vmax.f32 %v1381_v35, %v1417_v63  ;;  %v1379_v37 = vmax.f32 %v2732_v40, %v984_v18  ;;  %v1415_v5 = vmax.f32 %v2734_v41, %v1272_v26  ;;  %v1529_v6 = vmax.f32 %v1493_v0, 0.0 }
 0x131   :  { %v1491_v28 = vadd.f32 %v2831_v8, %v1448_v4  ;;  %v2193_v29 = vpop.f32.mrf.mxu0  ;;  %v2265_v38 = vpop.f32.mrf.mxu1 }
 0x132   :  { %v1382_v39 = vmax.f32 %v2736_v42, %v2193_v29  ;;  %v1418_v9 = vmax.f32 %v2738_v43, %v2265_v38  ;;  %v1985_v1 = vpack.c.bf16 %v1529_v6, %v1528_v27  ;;  %v1451_v20 = vmax.f32 %v1379_v37, %v1415_v5 }
 0x133   :  { %v1527_v7 = vmax.f32 %v1491_v28, 0.0  ;;  %v987_v21 = vpop.f32.mrf.mxu0  ;;  %v1275_v14 = vpop.f32.mrf.mxu1  ;;  %v1496_v40 = vadd.f32 %v2831_v8, %v1453_v19 }
 0x134   :  { %v1454_v30 = vmax.f32 %v1382_v39, %v1418_v9  ;;  %v1380_v41 = vmax.f32 %v2740_v44, %v987_v21  ;;  %2051 = vst [vmem:[%s2994_s3 + $0x28] sm:$0xff] %v1985_v1   ;;  %v1416_v42 = vmax.f32 %v2742_v45, %v1275_v14  ;;  %v1494_v44 = vadd.f32 %v2831_v8, %v1451_v20 }
 0x135   :  { %v1980_v15 = vpack.c.bf16 %v1527_v7, %v1526_v10  ;;  %v2196_v31 = vpop.f32.mrf.mxu0  ;;  %v2268_v43 = vpop.f32.mrf.mxu1  ;;  %v1532_v16 = vmax.f32 %v1496_v40, 0.0 }
 0x136   :  { %v1497_v12 = vadd.f32 %v2831_v8, %v1454_v30  ;;  %v1385_v13 = vmax.f32 %v2744_v46, %v2196_v31  ;;  %v1421_v22 = vmax.f32 %v2746_v47, %v2268_v43  ;;  %v1452_v23 = vmax.f32 %v1380_v41, %v1416_v42 }
 0x137   :  { %2050 = vst [vmem:[%s2994_s3 + $0x20] sm:$0xff] %v1980_v15   ;;  %v1000_v2 = vpop.f32.mrf.mxu0  ;;  %v1288_v11 = vpop.f32.mrf.mxu1  ;;  %v1530_v35 = vmax.f32 %v1494_v44, 0.0 }
 0x138   :  { %v1533_v17 = vmax.f32 %v1497_v12, 0.0  ;;  %v1383_v45 = vmax.f32 %v2748_v48, %v1000_v2  ;;  %v1419_v32 = vmax.f32 %v2750_v49, %v1288_v11  ;;  %v1495_v33 = vadd.f32 %v2831_v8, %v1452_v23 }
 0x139   :  { %v1457_v46 = vmax.f32 %v1385_v13, %v1421_v22  ;;  %v2197_v3 = vpop.f32.mrf.mxu0  ;;  %v2269_v47 = vpop.f32.mrf.mxu1  ;;  %v3018_v13 = vld [vmem:[#allocation2_spill] sm:$0xff] }
 0x13a   :  { %v1995_v24 = vpack.c.bf16 %v1533_v17, %v1532_v16  ;;  %v1455_v25 = vmax.f32 %v1383_v45, %v1419_v32  ;;  %v1386_v34 = vmax.f32 %v2752_v50, %v2197_v3  ;;  %v1531_v63 = vmax.f32 %v1495_v33, 0.0  ;;  %v3019_v17 = vld [vmem:[#allocation3_spill] sm:$0xff]  ;;  %v3020_v45 = vld [vmem:[#allocation4_spill] sm:$0xff] }
 0x13b   :  { %v1422_v36 = vmax.f32 %v2754_v51, %v2269_v47  ;;  %v1003_v0 = vpop.f32.mrf.mxu0  ;;  %v1291_v4 = vpop.f32.mrf.mxu1  ;;  %v1500_v26 = vadd.f32 %v2831_v8, %v1457_v46 }
 0x13c   :  { %2053 = vst [vmem:[%s2994_s3 + $0x38] sm:$0xff] %v1995_v24   ;;  %v1384_v48 = vmax.f32 %v2756_v52, %v1003_v0  ;;  %v1420_v49 = vmax.f32 %v2758_v53, %v1291_v4  ;;  %v1990_v18 = vpack.c.bf16 %v1531_v63, %v1530_v35  ;;  %v1498_v5 = vadd.f32 %v2831_v8, %v1455_v25  ;;  %v3021_v24 = vld [vmem:[#allocation5_spill] sm:$0xff] }
 0x13d   :  { %v1458_v19 = vmax.f32 %v1386_v34, %v1422_v36  ;;  %v2200_v37 = vpop.f32.mrf.mxu0  ;;  %v2272_v50 = vpop.f32.mrf.mxu1  ;;  %v1536_v9 = vmax.f32 %v1500_v26, 0.0  ;;  %v3022_v34 = vld [vmem:[#allocation6_spill] sm:$0xff] }
 0x13e   :  { %v1456_v27 = vmax.f32 %v1384_v48, %v1420_v49  ;;  %v1389_v51 = vmax.f32 %v2760_v54, %v2200_v37  ;;  %v1425_v6 = vmax.f32 %v2762_v55, %v2272_v50  ;;  %2052 = vst [vmem:[%s2994_s3 + $0x30] sm:$0xff] %v1990_v18   ;;  %v1534_v55 = vmax.f32 %v1498_v5, 0.0  ;;  %v3024_v5 = vld [vmem:[#allocation8_spill] sm:$0xff] }
 0x13f   :  { %v1501_v52 = vadd.f32 %v2831_v8, %v1458_v19  ;;  %v1016_v53 = vpop.f32.mrf.mxu0  ;;  %v1304_v28 = vpop.f32.mrf.mxu1  ;;  %v3023_v19 = vld [vmem:[#allocation7_spill] sm:$0xff] }
 0x140   :  { %v1499_v29 = vadd.f32 %v2831_v8, %v1456_v27  ;;  %v1387_v38 = vmax.f32 %v2764_v56, %v1016_v53  ;;  %v1423_v39 = vmax.f32 %v2766_v57, %v1304_v28  ;;  %v1461_v1 = vmax.f32 %v1389_v51, %v1425_v6  ;;  %v3025_v53 = vld [vmem:[#allocation9_spill] sm:$0xff] }
 0x141   :  { %v1537_v10 = vmax.f32 %v1501_v52, 0.0  ;;  %v2201_v54 = vpop.f32.mrf.mxu0  ;;  %v2273_v7 = vpop.f32.mrf.mxu1 }
 0x142   :  { %v1535_v20 = vmax.f32 %v1499_v29, 0.0  ;;  %v1390_v21 = vmax.f32 %v2768_v58, %v2201_v54  ;;  %v1459_v40 = vmax.f32 %v1387_v38, %v1423_v39  ;;  %v1426_v30 = vmax.f32 %v2770_v59, %v2273_v7  ;;  %v3026_v29 = vld [vmem:[#allocation10_spill] sm:$0xff] }
 0x143   :  { %v2005_v14 = vpack.c.bf16 %v1537_v10, %v1536_v9  ;;  %v1019_v41 = vpop.f32.mrf.mxu0  ;;  %v1307_v15 = vpop.f32.mrf.mxu1  ;;  %v1504_v57 = vadd.f32 %v2831_v8, %v1461_v1 }
 0x144   :  { %v2000_v42 = vpack.c.bf16 %v1535_v20, %v1534_v55  ;;  %v1388_v56 = vmax.f32 %v2772_v60, %v1019_v41  ;;  %v1462_v31 = vmax.f32 %v1390_v21, %v1426_v30  ;;  %v1424_v43 = vmax.f32 %v2774_v61, %v1307_v15  ;;  %v3027_v55 = vld [vmem:[#allocation11_spill] sm:$0xff]  ;;  %v3028_v21 = vld [vmem:[#allocation12_spill] sm:$0xff] }
 0x145   :  { %2055 = vst [vmem:[%s2994_s3 + $0x48] sm:$0xff] %v2005_v14   ;;  %v2204_v12 = vpop.f32.mrf.mxu0  ;;  %v2276_v58 = vpop.f32.mrf.mxu1  ;;  %v1502_v60 = vadd.f32 %v2831_v8, %v1459_v40  ;;  %v1540_v33 = vmax.f32 %v1504_v57, 0.0  ;;  %v3029_v57 = vld [vmem:[#allocation13_spill] sm:$0xff] }
 0x146   :  { %2054 = vst [vmem:[%s2994_s3 + $0x40] sm:$0xff] %v2000_v42   ;;  %v1393_v59 = vmax.f32 %v2776_v62, %v2204_v12  ;;  %v1429_v22 = vmax.f32 %v3018_v13, %v2276_v58  ;;  %v1505_v44 = vadd.f32 %v2831_v8, %v1462_v31  ;;  %v1460_v23 = vmax.f32 %v1388_v56, %v1424_v43  ;;  %v3030_v58 = vld [vmem:[#allocation14_spill] sm:$0xff] }
 0x147   :  { %v1032_v2 = vpop.f32.mrf.mxu0  ;;  %v1320_v11 = vpop.f32.mrf.mxu1  ;;  %v1538_v63 = vmax.f32 %v1502_v60, 0.0  ;;  %v3031_v60 = vld [vmem:[#allocation15_spill] sm:$0xff] }
 0x148   :  { %v1465_v16 = vmax.f32 %v1393_v59, %v1429_v22  ;;  %v1391_v61 = vmax.f32 %v3019_v17, %v1032_v2  ;;  %v1427_v32 = vmax.f32 %v3020_v45, %v1320_v11  ;;  %v1541_v46 = vmax.f32 %v1505_v44, 0.0 }
 0x149   :  { %v1503_v3 = vadd.f32 %v2831_v8, %v1460_v23  ;;  %v2205_v47 = vpop.f32.mrf.mxu0  ;;  %v2277_v62 = vpop.f32.mrf.mxu1  ;;  %v3032_v23 = vld [vmem:[#allocation16_spill] sm:$0xff] }
 0x14a   :  { %v1394_v25 = vmax.f32 %v3021_v24, %v2205_v47  ;;  %v1430_v35 = vmax.f32 %v3022_v34, %v2277_v62  ;;  %v2015_v36 = vpack.c.bf16 %v1541_v46, %v1540_v33  ;;  %v1463_v4 = vmax.f32 %v1391_v61, %v1427_v32  ;;  %v3033_v46 = vld [vmem:[#allocation17_spill] sm:$0xff]  ;;  %v3034_v47 = vld [vmem:[#allocation18_spill] sm:$0xff] }
 0x14b   :  { %v1539_v0 = vmax.f32 %v1503_v3, 0.0  ;;  %v1035_v48 = vpop.f32.mrf.mxu0  ;;  %v1323_v49 = vpop.f32.mrf.mxu1  ;;  %v1508_v18 = vadd.f32 %v2831_v8, %v1465_v16 }
 0x14c   :  { %v1466_v26 = vmax.f32 %v1394_v25, %v1430_v35  ;;  %v1392_v37 = vmax.f32 %v3023_v19, %v1035_v48  ;;  %2057 = vst [vmem:[%s2994_s3 + $0x58] sm:$0xff] %v2015_v36   ;;  %v1428_v27 = vmax.f32 %v3024_v5, %v1323_v49  ;;  %v1506_v39 = vadd.f32 %v2831_v8, %v1463_v4  ;;  %v3037_v5 = vld [vmem:[#allocation21_spill] sm:$0xff] }
 0x14d   :  { %v2010_v50 = vpack.c.bf16 %v1539_v0, %v1538_v63  ;;  %v2208_v51 = vpop.f32.mrf.mxu0  ;;  %v2280_v6 = vpop.f32.mrf.mxu1  ;;  %v1544_v54 = vmax.f32 %v1508_v18, 0.0  ;;  %v3035_v63 = vld [vmem:[#allocation19_spill] sm:$0xff]  ;;  %v3036_v0 = vld [vmem:[#allocation20_spill] sm:$0xff] }
 0x14e   :  { %v1509_v52 = vadd.f32 %v2831_v8, %v1466_v26  ;;  %v1397_v28 = vmax.f32 %v3025_v53, %v2208_v51  ;;  %v1433_v38 = vmax.f32 %v3026_v29, %v2280_v6  ;;  %v1464_v9 = vmax.f32 %v1392_v37, %v1428_v27 }
 0x14f   :  { %2056 = vst [vmem:[%s2994_s3 + $0x50] sm:$0xff] %v2010_v50   ;;  %v1048_v10 = vpop.f32.mrf.mxu0  ;;  %v1336_v1 = vpop.f32.mrf.mxu1  ;;  %v1542_v43 = vmax.f32 %v1506_v39, 0.0  ;;  %v3039_v39 = vld [vmem:[#allocation23_spill] sm:$0xff] }
 0x150   :  { %v1545_v7 = vmax.f32 %v1509_v52, 0.0  ;;  %v1395_v20 = vmax.f32 %v3027_v55, %v1048_v10  ;;  %v1431_v14 = vmax.f32 %v3028_v21, %v1336_v1  ;;  %v1507_v40 = vadd.f32 %v2831_v8, %v1464_v9  ;;  %v3038_v52 = vld [vmem:[#allocation22_spill] sm:$0xff] }
 0x151   :  { %v1469_v30 = vmax.f32 %v1397_v28, %v1433_v38  ;;  %v2209_v41 = vpop.f32.mrf.mxu0  ;;  %v2281_v15 = vpop.f32.mrf.mxu1 }
 0x152   :  { %v2025_v42 = vpack.c.bf16 %v1545_v7, %v1544_v54  ;;  %v1467_v56 = vmax.f32 %v1395_v20, %v1431_v14  ;;  %v1398_v31 = vmax.f32 %v3029_v57, %v2209_v41  ;;  %v1543_v12 = vmax.f32 %v1507_v40, 0.0  ;;  %v3040_v54 = vld [vmem:[#allocation24_spill] sm:$0xff] }
 0x153   :  { %v1434_v59 = vmax.f32 %v3030_v58, %v2281_v15  ;;  %v1051_v13 = vpop.f32.mrf.mxu0  ;;  %v1339_v22 = vpop.f32.mrf.mxu1  ;;  %v1512_v16 = vadd.f32 %v2831_v8, %v1469_v30 }
 0x154   :  { %2059 = vst [vmem:[%s2994_s3 + $0x68] sm:$0xff] %v2025_v42   ;;  %v1396_v44 = vmax.f32 %v3031_v60, %v1051_v13  ;;  %v1432_v2 = vmax.f32 %v3032_v23, %v1339_v22  ;;  %v2020_v11 = vpack.c.bf16 %v1543_v12, %v1542_v43  ;;  %v1510_v32 = vadd.f32 %v2831_v8, %v1467_v56 }
 0x155   :  { %v1470_v17 = vmax.f32 %v1398_v31, %v1434_v59  ;;  %v2212_v61 = vpop.f32.mrf.mxu0  ;;  %v2284_v45 = vpop.f32.mrf.mxu1  ;;  %v1548_v48 = vmax.f32 %v1512_v16, 0.0 }
 0x156   :  { %v1468_v33 = vmax.f32 %v1396_v44, %v1432_v2  ;;  %v1401_v3 = vmax.f32 %v3033_v46, %v2212_v61  ;;  %v1437_v62 = vmax.f32 %v3034_v47, %v2284_v45  ;;  %2058 = vst [vmem:[%s2994_s3 + $0x60] sm:$0xff] %v2020_v11   ;;  %v1546_v37 = vmax.f32 %v1510_v32, 0.0 }
 0x157   :  { %v1513_v24 = vadd.f32 %v2831_v8, %v1470_v17  ;;  %v1064_v25 = vpop.f32.mrf.mxu0  ;;  %v1352_v34 = vpop.f32.mrf.mxu1 }
 0x158   :  { %v1511_v35 = vadd.f32 %v2831_v8, %v1468_v33  ;;  %v1399_v36 = vmax.f32 %v3035_v63, %v1064_v25  ;;  %v1435_v4 = vmax.f32 %v3036_v0, %v1352_v34  ;;  %v1473_v18 = vmax.f32 %v1401_v3, %v1437_v62 }
 0x159   :  { %v1549_v49 = vmax.f32 %v1513_v24, 0.0  ;;  %v2213_v26 = vpop.f32.mrf.mxu0  ;;  %v2285_v19 = vpop.f32.mrf.mxu1 }
 0x15a   :  { %v1547_v50 = vmax.f32 %v1511_v35, 0.0  ;;  %v1402_v27 = vmax.f32 %v3037_v5, %v2213_v26  ;;  %v1471_v6 = vmax.f32 %v1399_v36, %v1435_v4  ;;  %v1438_v53 = vmax.f32 %v3038_v52, %v2285_v19 }
 0x15b   :  { %v2035_v51 = vpack.c.bf16 %v1549_v49, %v1548_v48  ;;  %v1067_v28 = vpop.f32.mrf.mxu0  ;;  %v1355_v29 = vpop.f32.mrf.mxu1  ;;  %v1516_v10 = vadd.f32 %v2831_v8, %v1473_v18 }
 0x15c   :  { %v2030_v38 = vpack.c.bf16 %v1547_v50, %v1546_v37  ;;  %v1400_v9 = vmax.f32 %v3039_v39, %v1067_v28  ;;  %v1474_v1 = vmax.f32 %v1402_v27, %v1438_v53  ;;  %v1436_v7 = vmax.f32 %v3040_v54, %v1355_v29 }
 0x15d   :  { %2061 = vst [vmem:[%s2994_s3 + $0x78] sm:$0xff] %v2035_v51   ;;  %v1514_v55 = vadd.f32 %v2831_v8, %v1471_v6  ;;  %v1552_v14 = vmax.f32 %v1516_v10, 0.0 }
 0x15e   :  { %2060 = vst [vmem:[%s2994_s3 + $0x70] sm:$0xff] %v2030_v38   ;;  %v1517_v20 = vadd.f32 %v2831_v8, %v1474_v1  ;;  %v1472_v21 = vmax.f32 %v1400_v9, %v1436_v7 }
 0x15f   :  { %v1550_v41 = vmax.f32 %v1514_v55, 0.0 }
 0x160   :  { %v1553_v40 = vmax.f32 %v1517_v20, 0.0  ;;  %v1515_v30 = vadd.f32 %v2831_v8, %v1472_v21 }
 0x162   :  { %v2045_v15 = vpack.c.bf16 %v1553_v40, %v1552_v14  ;;  %v1551_v42 = vmax.f32 %v1515_v30, 0.0 }
 0x164   :  { %2063 = vst [vmem:[%s2994_s3 + $0x88] sm:$0xff] %v2045_v15   ;;  %v2040_v56 = vpack.c.bf16 %v1551_v42, %v1550_v41 }
 0x166   :  { %2062 = vst [vmem:[%s2994_s3 + $0x80] sm:$0xff] %v2040_v56  }

// kernel: net_forward.4
= control target key start
LH: loop header
LB: loop body
LE: loop exit
PB: predicated region body
PF: predicated region fallthrough
CT: control target
= control target key end

     0   :  { %vm255_vm0 = vcmask 1044480   ;;  %vm230_vm1 = vcmask 998400   ;;  %s722_s1 = inlined_call_operand.vmem [shape: bf16[250,128], index: 1, kind: input, shape index: {}]   ;;  %s723_s0 = inlined_call_operand.vmem [shape: bf16[128,250], index: 0, kind: input, shape index: {}]   ;;  %s724_s2 = inlined_call_operand.vmem [shape: f32[1,128], index: 2, kind: input, shape index: {}]   ;;  %s725_s3 = inlined_call_operand.vmem [shape: bf16[32,128], index: 3, kind: output, shape index: {}]  }
   0x1   :  { %v549_v0 = vld [vmem:[%s722_s1 + $0x78] sm:$0x1f]   ;;  %v551_v2 = vld [vmem:[%s722_s1 + $0x70] sm:$0xff]   ;;  %v553_v4 = vld [vmem:[%s722_s1 + $0x68] sm:$0xff]  }
   0x2   :  { %v550_v1 = vld [vmem:[%s722_s1 + $0x38] sm:$0xff]   ;;  %547 = vmatprep.subr.msk.bf16.mxu0 %vm255_vm0, %v549_v0  ;;  %548 = vmatprep.subr.msk.bf16.mxu1 %vm255_vm0, %v549_v0  ;;  %v552_v3 = vld [vmem:[%s722_s1 + $0x30] sm:$0xff]   ;;  %v554_v5 = vld [vmem:[%s722_s1 + $0x28] sm:$0xff]  }
   0x3   :  { %468 = vmatpush3.bf16.msra.mxu0 %v550_v1  ;;  %539 = vmatpush3.bf16.msra.mxu1 %v550_v1  ;;  %v555_v6 = vld [vmem:[%s722_s1 + $0x60] sm:$0xff]   ;;  %v557_v8 = vld [vmem:[%s722_s1 + $0x58] sm:$0xff]   ;;  %v559_v10 = vld [vmem:[%s722_s1 + $0x50] sm:$0xff]  }
   0x4   :  { %469 = vmatprep.subr.bf16.mxu0 %v551_v2  ;;  %532 = vmatprep.subr.bf16.mxu1 %v551_v2  ;;  %v556_v7 = vld [vmem:[%s722_s1 + $0x20] sm:$0xff]   ;;  %v558_v9 = vld [vmem:[%s722_s1 + $0x18] sm:$0xff]   ;;  %v560_v13 = vld [vmem:[%s722_s1 + $0x10] sm:$0xff]  }
   0x5   :  { %v567_v11 = vld [vmem:[%s723_s0 + $0x4] ss:$8 sps:$4 sm:$0xff]   ;;  %v565_v18 = vld [vmem:[%s723_s0] ss:$8 sps:$4 sm:$0xff]   ;;  %v571_v20 = vld [vmem:[%s723_s0 + $0x14] ss:$8 sps:$4 sm:$0xff]  }
   0x6   :  { %v570_v12 = vld [vmem:[%s723_s0 + $0x44] ss:$8 sps:$4 sm:$0xff]   ;;  %439 = vmatprep.mubr.msk.bf16.mxu0 %vm230_vm1, %v567_v11  ;;  %v568_v19 = vld [vmem:[%s723_s0 + $0x40] ss:$8 sps:$4 sm:$0xff]   ;;  %v573_v21 = vld [vmem:[%s723_s0 + $0x54] ss:$8 sps:$4 sm:$0xff]  }
   0x7   :  { %470 = vmatpush3.bf16.msra.mxu0 %v552_v3  ;;  %540 = vmatpush3.bf16.msra.mxu1 %v552_v3  ;;  %v561_v14 = vld [vmem:[%s722_s1 + $0x48] sm:$0xff]   ;;  %v563_v16 = vld [vmem:[%s722_s1 + $0x40] sm:$0xff]   ;;  %v575_v22 = vld [vmem:[%s723_s0 + $0x10] ss:$8 sps:$4 sm:$0xff]  }
   0x8   :  { %471 = vmatprep.subr.bf16.mxu0 %v553_v4  ;;  %533 = vmatprep.subr.bf16.mxu1 %v553_v4  ;;  %v562_v15 = vld [vmem:[%s722_s1 + $0x8] sm:$0xff]   ;;  %v564_v17 = vld [vmem:[%s722_s1] sm:$0xff]   ;;  %v576_v23 = vld [vmem:[%s723_s0 + $0x50] ss:$8 sps:$4 sm:$0xff]  }
   0x9   :  { %443 = vmatprep.mubr.msk.bf16.mxu1 %vm230_vm1, %v570_v12  ;;  %v577_v24 = vld [vmem:[%s723_s0 + $0x24] ss:$8 sps:$4 sm:$0xff]   ;;  %v581_v26 = vld [vmem:[%s723_s0 + $0x20] ss:$8 sps:$4 sm:$0xff]   ;;  %v583_v28 = vld [vmem:[%s723_s0 + $0x34] ss:$8 sps:$4 sm:$0xff]  }
   0xa   :  { %v579_v25 = vld [vmem:[%s723_s0 + $0x64] ss:$8 sps:$4 sm:$0xff]   ;;  %v582_v27 = vld [vmem:[%s723_s0 + $0x60] ss:$8 sps:$4 sm:$0xff]   ;;  %v585_v29 = vld [vmem:[%s723_s0 + $0x74] ss:$8 sps:$4 sm:$0xff]  }
   0xb   :  { %472 = vmatpush3.bf16.msra.mxu0 %v554_v5  ;;  %541 = vmatpush3.bf16.msra.mxu1 %v554_v5  ;;  %v587_v30 = vld [vmem:[%s723_s0 + $0x30] ss:$8 sps:$4 sm:$0xff]   ;;  %v447_v1 = vld [vmem:[%s724_s2] ss:$0 sm:$0xff] }
   0xc   :  { %473 = vmatprep.subr.bf16.mxu0 %v555_v6  ;;  %534 = vmatprep.subr.bf16.mxu1 %v555_v6  ;;  %v588_v31 = vld [vmem:[%s723_s0 + $0x70] ss:$8 sps:$4 sm:$0xff]  }
   0xf   :  { %474 = vmatpush3.bf16.msra.mxu0 %v556_v7  ;;  %542 = vmatpush3.bf16.msra.mxu1 %v556_v7 }
  0x10   :  { %475 = vmatprep.subr.bf16.mxu0 %v557_v8  ;;  %535 = vmatprep.subr.bf16.mxu1 %v557_v8 }
  0x13   :  { %476 = vmatpush3.bf16.msra.mxu0 %v558_v9  ;;  %543 = vmatpush3.bf16.msra.mxu1 %v558_v9 }
  0x14   :  { %477 = vmatprep.subr.bf16.mxu0 %v559_v10  ;;  %536 = vmatprep.subr.bf16.mxu1 %v559_v10 }
  0x17   :  { %478 = vmatpush3.bf16.msra.mxu0 %v560_v13  ;;  %544 = vmatpush3.bf16.msra.mxu1 %v560_v13 }
  0x18   :  { %479 = vmatprep.subr.bf16.mxu0 %v561_v14  ;;  %537 = vmatprep.subr.bf16.mxu1 %v561_v14 }
  0x1b   :  { %480 = vmatpush3.bf16.msra.mxu0 %v562_v15  ;;  %545 = vmatpush3.bf16.msra.mxu1 %v562_v15 }
  0x1c   :  { %481 = vmatprep.subr.bf16.mxu0 %v563_v16  ;;  %538 = vmatprep.subr.bf16.mxu1 %v563_v16 }
  0x1f   :  { %482 = vmatpush3.bf16.msra.mxu0 %v564_v17  ;;  %546 = vmatpush3.bf16.msra.mxu1 %v564_v17 }
  0x22   :  { %292 = vmatmul.mubr.bf16.vlgmr.msra.gmra.mxu0 %v565_v18  ;;  %324 = vmatmul.mubr.bf16.vlgmr.msra.gmra.mxu1 %v568_v19 }
  0x23   :  { %440 = vmatprep.mubr.msk.bf16.mxu0 %vm230_vm1, %v571_v20  ;;  %444 = vmatprep.mubr.msk.bf16.mxu1 %vm230_vm1, %v573_v21 }
  0x2a   :  { %300 = vmatmul.mubr.bf16.gmra.mxu0 %v575_v22  ;;  %332 = vmatmul.mubr.bf16.gmra.mxu1 %v576_v23 }
  0x2b   :  { %441 = vmatprep.mubr.msk.bf16.mxu0 %vm230_vm1, %v577_v24  ;;  %445 = vmatprep.mubr.msk.bf16.mxu1 %vm230_vm1, %v579_v25 }
  0x32   :  { %308 = vmatmul.mubr.bf16.gmra.mxu0 %v581_v26  ;;  %340 = vmatmul.mubr.bf16.gmra.mxu1 %v582_v27 }
  0x33   :  { %442 = vmatprep.mubr.msk.bf16.mxu0 %vm230_vm1, %v583_v28  ;;  %446 = vmatprep.mubr.msk.bf16.mxu1 %vm230_vm1, %v585_v29 }
  0x3a   :  { %316 = vmatmul.mubr.bf16.gmra.mxu0 %v587_v30  ;;  %348 = vmatmul.mubr.bf16.gmra.mxu1 %v588_v31 }
  0xe2   :  { %v483_v32 = vpop.f32.mrf.mxu0  ;;  %v507_v33 = vpop.f32.mrf.mxu1 }
  0xe4   :  { %v484_v34 = vpop.f32.mrf.mxu0  ;;  %v508_v35 = vpop.f32.mrf.mxu1 }
  0xe5   :  { %v485_v52 = vadd.f32 %v484_v34, %v483_v32  ;;  %v509_v53 = vadd.f32 %v508_v35, %v507_v33 }
  0xe6   :  { %v486_v36 = vpop.f32.mrf.mxu0  ;;  %v510_v37 = vpop.f32.mrf.mxu1 }
  0xe8   :  { %v487_v38 = vpop.f32.mrf.mxu0  ;;  %v511_v39 = vpop.f32.mrf.mxu1 }
  0xe9   :  { %v488_v60 = vadd.f32 %v487_v38, %v486_v36  ;;  %v512_v63 = vadd.f32 %v511_v39, %v510_v37 }
  0xea   :  { %v489_v40 = vpop.f32.mrf.mxu0  ;;  %v513_v41 = vpop.f32.mrf.mxu1 }
  0xec   :  { %v490_v42 = vpop.f32.mrf.mxu0  ;;  %v514_v43 = vpop.f32.mrf.mxu1 }
  0xed   :  { %v491_v8 = vadd.f32 %v490_v42, %v489_v40  ;;  %v515_v12 = vadd.f32 %v514_v43, %v513_v41 }
  0xee   :  { %v492_v44 = vpop.f32.mrf.mxu0  ;;  %v516_v45 = vpop.f32.mrf.mxu1 }
  0xf0   :  { %v493_v46 = vpop.f32.mrf.mxu0  ;;  %v517_v47 = vpop.f32.mrf.mxu1 }
  0xf1   :  { %v494_v21 = vadd.f32 %v493_v46, %v492_v44  ;;  %v518_v22 = vadd.f32 %v517_v47, %v516_v45 }
  0xf2   :  { %v495_v48 = vpop.f32.mrf.mxu0  ;;  %v519_v49 = vpop.f32.mrf.mxu1 }
  0xf4   :  { %v496_v50 = vpop.f32.mrf.mxu0  ;;  %v520_v51 = vpop.f32.mrf.mxu1 }
  0xf5   :  { %v497_v54 = vadd.f32 %v496_v50, %v495_v48  ;;  %v521_v55 = vadd.f32 %v520_v51, %v519_v49 }
  0xf6   :  { %v498_v56 = vpop.f32.mrf.mxu0  ;;  %v522_v57 = vpop.f32.mrf.mxu1 }
  0xf7   :  { %v356_v58 = vmax.f32 %v485_v52, %v497_v54  ;;  %v360_v59 = vmax.f32 %v509_v53, %v521_v55 }
  0xf8   :  { %v499_v61 = vpop.f32.mrf.mxu0  ;;  %v523_v62 = vpop.f32.mrf.mxu1 }
  0xf9   :  { %v364_v0 = vmax.f32 %v356_v58, %v360_v59  ;;  %v500_v2 = vadd.f32 %v499_v61, %v498_v56  ;;  %v524_v3 = vadd.f32 %v523_v62, %v522_v57 }
  0xfa   :  { %v501_v4 = vpop.f32.mrf.mxu0  ;;  %v525_v5 = vpop.f32.mrf.mxu1 }
  0xfb   :  { %v357_v6 = vmax.f32 %v488_v60, %v500_v2  ;;  %v361_v7 = vmax.f32 %v512_v63, %v524_v3  ;;  %v375_v9 = vadd.f32 %v447_v1, %v364_v0 }
  0xfc   :  { %v502_v10 = vpop.f32.mrf.mxu0  ;;  %v526_v11 = vpop.f32.mrf.mxu1 }
  0xfd   :  { %v365_v13 = vmax.f32 %v357_v6, %v361_v7  ;;  %v503_v14 = vadd.f32 %v502_v10, %v501_v4  ;;  %v527_v15 = vadd.f32 %v526_v11, %v525_v5  ;;  %v379_v23 = vmax.f32 %v375_v9, 0.0 }
  0xfe   :  { %v504_v16 = vpop.f32.mrf.mxu0  ;;  %v528_v17 = vpop.f32.mrf.mxu1 }
  0xff   :  { %v376_v18 = vadd.f32 %v447_v1, %v365_v13  ;;  %v358_v19 = vmax.f32 %v491_v8, %v503_v14  ;;  %v362_v20 = vmax.f32 %v515_v12, %v527_v15 }
 0x100   :  { %v505_v24 = vpop.f32.mrf.mxu0  ;;  %v529_v25 = vpop.f32.mrf.mxu1 }
 0x101   :  { %v380_v26 = vmax.f32 %v376_v18, 0.0  ;;  %v366_v27 = vmax.f32 %v358_v19, %v362_v20  ;;  %v506_v28 = vadd.f32 %v505_v24, %v504_v16  ;;  %v530_v29 = vadd.f32 %v529_v25, %v528_v17 }
 0x103   :  { %v459_v30 = vpack.c.bf16 %v380_v26, %v379_v23  ;;  %v359_v31 = vmax.f32 %v494_v21, %v506_v28  ;;  %v363_v32 = vmax.f32 %v518_v22, %v530_v29  ;;  %v377_v33 = vadd.f32 %v447_v1, %v366_v27 }
 0x105   :  { %460 = vst [vmem:[%s725_s3] sm:$0xff] %v459_v30   ;;  %v367_v34 = vmax.f32 %v359_v31, %v363_v32  ;;  %v381_v36 = vmax.f32 %v377_v33, 0.0 }
 0x107   :  { %v378_v35 = vadd.f32 %v447_v1, %v367_v34 }
 0x109   :  { %v382_v37 = vmax.f32 %v378_v35, 0.0 }
 0x10b   :  { %v464_v38 = vpack.c.bf16 %v382_v37, %v381_v36 }
 0x10d   :  { %466 = vst [vmem:[%s725_s3 + $0x8] sm:$0xff] %v464_v38  }

// kernel: net_forward.5
= control target key start
LH: loop header
LB: loop body
LE: loop exit
PB: predicated region body
PF: predicated region fallthrough
CT: control target
= control target key end

     0   :  { %vm2083_vm0 = vmmov 0   ;;  %s2555_s1 = inlined_call_operand.vmem [shape: bf16[2048,128], index: 1, kind: input, shape index: {}]   ;;  %s2556_s0 = inlined_call_operand.vmem [shape: bf16[8,2048], index: 0, kind: input, shape index: {}]   ;;  %s2557_s3 = inlined_call_operand.vmem [shape: bf16[128,128], index: 3, kind: input, shape index: {}]   ;;  %s2558_s2 = inlined_call_operand.vmem [shape: f32[1,128], index: 2, kind: input, shape index: {}]   ;;  %s2559_s4 = inlined_call_operand.vmem [shape: f32[1,128], index: 4, kind: input, shape index: {}]   ;;  %s2560_s5 = inlined_call_operand.vmem [shape: f32[8,128], index: 5, kind: output, shape index: {}]  }
   0x1   :  { %v1926_v0 = vld [vmem:[%s2555_s1 + $0x78] sm:$0xff]   ;;  %v1930_v4 = vld [vmem:[%s2555_s1 + $0x70] sm:$0xff]   ;;  %v1934_v8 = vld [vmem:[%s2555_s1 + $0x68] sm:$0xff]  }
   0x2   :  { %v1927_v1 = vld [vmem:[%s2555_s1 + $0xf8] sm:$0xff]   ;;  %1719 = vmatprep.subr.bf16.mxu0 %v1926_v0  ;;  %v1931_v5 = vld [vmem:[%s2555_s1 + $0xf0] sm:$0xff]   ;;  %v1935_v9 = vld [vmem:[%s2555_s1 + $0xe8] sm:$0xff]  }
   0x3   :  { %v1928_v2 = vld [vmem:[%s2555_s1 + $0x38] sm:$0xff]   ;;  %1741 = vmatprep.subr.bf16.mxu1 %v1927_v1  ;;  %v1932_v6 = vld [vmem:[%s2555_s1 + $0x30] sm:$0xff]   ;;  %v1936_v10 = vld [vmem:[%s2555_s1 + $0x28] sm:$0xff]  }
   0x4   :  { %v1929_v3 = vld [vmem:[%s2555_s1 + $0xb8] sm:$0xff]   ;;  %1720 = vmatpush3.bf16.msra.mxu0 %v1928_v2  ;;  %v1933_v7 = vld [vmem:[%s2555_s1 + $0xb0] sm:$0xff]   ;;  %v1937_v11 = vld [vmem:[%s2555_s1 + $0xa8] sm:$0xff]  }
   0x5   :  { %1742 = vmatpush3.bf16.msra.mxu1 %v1929_v3  ;;  %1721 = vmatprep.subr.bf16.mxu0 %v1930_v4  ;;  %v1938_v12 = vld [vmem:[%s2555_s1 + $0x60] sm:$0xff]   ;;  %v1942_v16 = vld [vmem:[%s2555_s1 + $0x58] sm:$0xff]   ;;  %v1946_v20 = vld [vmem:[%s2555_s1 + $0x50] sm:$0xff]  }
   0x6   :  { %1743 = vmatprep.subr.bf16.mxu1 %v1931_v5  ;;  %v1939_v13 = vld [vmem:[%s2555_s1 + $0xe0] sm:$0xff]   ;;  %v1943_v17 = vld [vmem:[%s2555_s1 + $0xd8] sm:$0xff]   ;;  %v1947_v21 = vld [vmem:[%s2555_s1 + $0xd0] sm:$0xff]  }
   0x7   :  { %v1940_v14 = vld [vmem:[%s2555_s1 + $0x20] sm:$0xff]   ;;  %v1944_v18 = vld [vmem:[%s2555_s1 + $0x18] sm:$0xff]   ;;  %v1948_v22 = vld [vmem:[%s2555_s1 + $0x10] sm:$0xff]  }
   0x8   :  { %1722 = vmatpush3.bf16.msra.mxu0 %v1932_v6  ;;  %v1941_v15 = vld [vmem:[%s2555_s1 + $0xa0] sm:$0xff]   ;;  %v1945_v19 = vld [vmem:[%s2555_s1 + $0x98] sm:$0xff]   ;;  %v1949_v23 = vld [vmem:[%s2555_s1 + $0x90] sm:$0xff]  }
   0x9   :  { %1744 = vmatpush3.bf16.msra.mxu1 %v1933_v7  ;;  %1723 = vmatprep.subr.bf16.mxu0 %v1934_v8  ;;  %v1950_v24 = vld [vmem:[%s2555_s1 + $0x48] sm:$0xff]   ;;  %v1954_v28 = vld [vmem:[%s2555_s1 + $0x40] sm:$0xff]   ;;  %v1962_v38 = vld [vmem:[%s2555_s1 + $0x178] sm:$0xff]  }
   0xa   :  { %1745 = vmatprep.subr.bf16.mxu1 %v1935_v9  ;;  %v1951_v25 = vld [vmem:[%s2555_s1 + $0xc8] sm:$0xff]   ;;  %v1955_v29 = vld [vmem:[%s2555_s1 + $0xc0] sm:$0xff]   ;;  %v1963_v39 = vld [vmem:[%s2555_s1 + $0x1f8] sm:$0xff]  }
   0xb   :  { %v1952_v26 = vld [vmem:[%s2555_s1 + $0x8] sm:$0xff]   ;;  %v1956_v30 = vld [vmem:[%s2555_s1] sm:$0xff]   ;;  %v1964_v40 = vld [vmem:[%s2555_s1 + $0x138] sm:$0xff]  }
   0xc   :  { %1724 = vmatpush3.bf16.msra.mxu0 %v1936_v10  ;;  %v1953_v27 = vld [vmem:[%s2555_s1 + $0x88] sm:$0xff]   ;;  %v1957_v31 = vld [vmem:[%s2555_s1 + $0x80] sm:$0xff]   ;;  %v1965_v41 = vld [vmem:[%s2555_s1 + $0x1b8] sm:$0xff]  }
   0xd   :  { %1746 = vmatpush3.bf16.msra.mxu1 %v1937_v11  ;;  %1725 = vmatprep.subr.bf16.mxu0 %v1938_v12  ;;  %v21_v32 = vld [vmem:[%s2556_s0] sm:$0xff]  ;;  %v22_v33 = vld [vmem:[%s2556_s0 + $0x8] sm:$0xff]  ;;  %v1966_v42 = vld [vmem:[%s2555_s1 + $0x170] sm:$0xff]  }
   0xe   :  { %1747 = vmatprep.subr.bf16.mxu1 %v1939_v13  ;;  %v1566_v34 = vcombine.low %v21_v32, %v21_v32  ;;  %v1567_v35 = vcombine.high %v21_v32, %v21_v32  ;;  %v1568_v36 = vcombine.low %v22_v33, %v22_v33  ;;  %v1569_v37 = vcombine.high %v22_v33, %v22_v33  ;;  %v1967_v43 = vld [vmem:[%s2555_s1 + $0x1f0] sm:$0xff]   ;;  %v1970_v46 = vld [vmem:[%s2555_s1 + $0x168] sm:$0xff]   ;;  %v1974_v50 = vld [vmem:[%s2555_s1 + $0x160] sm:$0xff]  }
   0xf   :  { %v1968_v44 = vld [vmem:[%s2555_s1 + $0x130] sm:$0xff]   ;;  %v1971_v47 = vld [vmem:[%s2555_s1 + $0x1e8] sm:$0xff]   ;;  %v1975_v51 = vld [vmem:[%s2555_s1 + $0x1e0] sm:$0xff]  }
  0x10   :  { %1726 = vmatpush3.bf16.msra.mxu0 %v1940_v14  ;;  %1148 = vmatprep.mubr.bf16.mxu0 %v1567_v35  ;;  %v1969_v45 = vld [vmem:[%s2555_s1 + $0x1b0] sm:$0xff]   ;;  %v1972_v48 = vld [vmem:[%s2555_s1 + $0x128] sm:$0xff]   ;;  %v1976_v52 = vld [vmem:[%s2555_s1 + $0x120] sm:$0xff]  }
  0x11   :  { %1748 = vmatpush3.bf16.msra.mxu1 %v1941_v15  ;;  %1727 = vmatprep.subr.bf16.mxu0 %v1942_v16  ;;  %v1973_v49 = vld [vmem:[%s2555_s1 + $0x1a8] sm:$0xff]   ;;  %v1977_v53 = vld [vmem:[%s2555_s1 + $0x1a0] sm:$0xff]   ;;  %v1978_v54 = vld [vmem:[%s2555_s1 + $0x158] sm:$0xff]  }
  0x12   :  { %1749 = vmatprep.subr.bf16.mxu1 %v1943_v17  ;;  %1188 = vmatprep.mubr.bf16.mxu1 %v1569_v37  ;;  %v1979_v55 = vld [vmem:[%s2555_s1 + $0x1d8] sm:$0xff]   ;;  %v1982_v58 = vld [vmem:[%s2555_s1 + $0x150] sm:$0xff]   ;;  %v1986_v62 = vld [vmem:[%s2555_s1 + $0x148] sm:$0xff]  }
  0x13   :  { %v1980_v56 = vld [vmem:[%s2555_s1 + $0x118] sm:$0xff]   ;;  %v1983_v59 = vld [vmem:[%s2555_s1 + $0x1d0] sm:$0xff]   ;;  %v1987_v63 = vld [vmem:[%s2555_s1 + $0x1c8] sm:$0xff]  }
  0x14   :  { %1728 = vmatpush3.bf16.msra.mxu0 %v1944_v18  ;;  %v1981_v57 = vld [vmem:[%s2555_s1 + $0x198] sm:$0xff]   ;;  %v1984_v60 = vld [vmem:[%s2555_s1 + $0x110] sm:$0xff]   ;;  %v1988_v0 = vld [vmem:[%s2555_s1 + $0x108] sm:$0xff]  }
  0x15   :  { %1750 = vmatpush3.bf16.msra.mxu1 %v1945_v19  ;;  %1729 = vmatprep.subr.bf16.mxu0 %v1946_v20  ;;  %v1985_v61 = vld [vmem:[%s2555_s1 + $0x190] sm:$0xff]   ;;  %v1989_v1 = vld [vmem:[%s2555_s1 + $0x188] sm:$0xff]   ;;  %v1990_v2 = vld [vmem:[%s2555_s1 + $0x140] sm:$0xff]  }
  0x16   :  { %1751 = vmatprep.subr.bf16.mxu1 %v1947_v21  ;;  %v1991_v3 = vld [vmem:[%s2555_s1 + $0x1c0] sm:$0xff]   ;;  %v23_v6 = vld [vmem:[%s2556_s0 + $0x10] sm:$0xff]  ;;  %v24_v9 = vld [vmem:[%s2556_s0 + $0x18] sm:$0xff] }
  0x17   :  { %v1992_v4 = vld [vmem:[%s2555_s1 + $0x100] sm:$0xff]   ;;  %v1570_v7 = vcombine.low %v23_v6, %v23_v6  ;;  %v1571_v8 = vcombine.high %v23_v6, %v23_v6  ;;  %v1572_v10 = vcombine.low %v24_v9, %v24_v9  ;;  %v1573_v11 = vcombine.high %v24_v9, %v24_v9  ;;  %v1998_v12 = vld [vmem:[%s2555_s1 + $0x278] sm:$0xff]   ;;  %v2002_v16 = vld [vmem:[%s2555_s1 + $0x270] sm:$0xff]  }
  0x18   :  { %1730 = vmatpush3.bf16.msra.mxu0 %v1948_v22  ;;  %v1993_v5 = vld [vmem:[%s2555_s1 + $0x180] sm:$0xff]   ;;  %v1999_v13 = vld [vmem:[%s2555_s1 + $0x2f8] sm:$0xff]   ;;  %v2003_v17 = vld [vmem:[%s2555_s1 + $0x2f0] sm:$0xff]  }
  0x19   :  { %1752 = vmatpush3.bf16.msra.mxu1 %v1949_v23  ;;  %1731 = vmatprep.subr.bf16.mxu0 %v1950_v24  ;;  %v2000_v14 = vld [vmem:[%s2555_s1 + $0x238] sm:$0xff]   ;;  %v2004_v18 = vld [vmem:[%s2555_s1 + $0x230] sm:$0xff]   ;;  %v2006_v20 = vld [vmem:[%s2555_s1 + $0x268] sm:$0xff]  }
  0x1a   :  { %1753 = vmatprep.subr.bf16.mxu1 %v1951_v25  ;;  %v2001_v15 = vld [vmem:[%s2555_s1 + $0x2b8] sm:$0xff]   ;;  %v2005_v19 = vld [vmem:[%s2555_s1 + $0x2b0] sm:$0xff]   ;;  %v2007_v21 = vld [vmem:[%s2555_s1 + $0x2e8] sm:$0xff]  }
  0x1b   :  { %v2008_v22 = vld [vmem:[%s2555_s1 + $0x228] sm:$0xff]   ;;  %v2010_v24 = vld [vmem:[%s2555_s1 + $0x260] sm:$0xff]   ;;  %v2018_v32 = vld [vmem:[%s2555_s1 + $0x250] sm:$0xff]  }
  0x1c   :  { %1732 = vmatpush3.bf16.msra.mxu0 %v1952_v26  ;;  %v2009_v23 = vld [vmem:[%s2555_s1 + $0x2a8] sm:$0xff]   ;;  %v2011_v25 = vld [vmem:[%s2555_s1 + $0x2e0] sm:$0xff]   ;;  %v2019_v33 = vld [vmem:[%s2555_s1 + $0x2d0] sm:$0xff]  }
  0x1d   :  { %1754 = vmatpush3.bf16.msra.mxu1 %v1953_v27  ;;  %1733 = vmatprep.subr.bf16.mxu0 %v1954_v28  ;;  %v2012_v26 = vld [vmem:[%s2555_s1 + $0x220] sm:$0xff]   ;;  %v2014_v28 = vld [vmem:[%s2555_s1 + $0x258] sm:$0xff]   ;;  %v2021_v35 = vld [vmem:[%s2555_s1 + $0x290] sm:$0xff]  }
  0x1e   :  { %1755 = vmatprep.subr.bf16.mxu1 %v1955_v29  ;;  %v2013_v27 = vld [vmem:[%s2555_s1 + $0x2a0] sm:$0xff]   ;;  %v2015_v29 = vld [vmem:[%s2555_s1 + $0x2d8] sm:$0xff]   ;;  %v2023_v37 = vld [vmem:[%s2555_s1 + $0x2c8] sm:$0xff]  }
  0x1f   :  { %v2054_v6 = vld [vmem:[%s2555_s1 + $0x350] sm:$0xff]  }
  0x20   :  { %1734 = vmatpush3.bf16.msra.mxu0 %v1956_v30  ;;  %v2016_v30 = vld [vmem:[%s2555_s1 + $0x218] sm:$0xff]   ;;  %v2057_v9 = vld [vmem:[%s2555_s1 + $0x390] sm:$0xff]  }
  0x21   :  { %1756 = vmatpush3.bf16.msra.mxu1 %v1957_v31  ;;  %1763 = vmatprep.subr.bf16.mxu0 %v1962_v38  ;;  %v2017_v31 = vld [vmem:[%s2555_s1 + $0x298] sm:$0xff]   ;;  %v2024_v38 = vld [vmem:[%s2555_s1 + $0x208] sm:$0xff]  }
  0x22   :  { %1785 = vmatprep.subr.bf16.mxu1 %v1963_v39  ;;  %v2025_v39 = vld [vmem:[%s2555_s1 + $0x288] sm:$0xff]  }
  0x23   :  { %1149 = vmatmul.mubr.bf16.vlgmr.msra.gmra.mxu0 %v1566_v34  ;;  %v2020_v34 = vld [vmem:[%s2555_s1 + $0x210] sm:$0xff]  }
  0x24   :  { %1189 = vmatmul.mubr.bf16.vlgmr.msra.gmra.mxu1 %v1568_v36  ;;  %1764 = vmatpush3.bf16.msra.mxu0 %v1964_v40  ;;  %v2022_v36 = vld [vmem:[%s2555_s1 + $0x248] sm:$0xff]   ;;  %v2026_v40 = vld [vmem:[%s2555_s1 + $0x240] sm:$0xff]  }
  0x25   :  { %1786 = vmatpush3.bf16.msra.mxu1 %v1965_v41  ;;  %1765 = vmatprep.subr.bf16.mxu0 %v1966_v42  ;;  %v2027_v41 = vld [vmem:[%s2555_s1 + $0x2c0] sm:$0xff]  }
  0x26   :  { %1787 = vmatprep.subr.bf16.mxu1 %v1967_v43  ;;  %1228 = vmatprep.mubr.bf16.mxu0 %v1571_v8  ;;  %v2028_v42 = vld [vmem:[%s2555_s1 + $0x200] sm:$0xff]   ;;  %v2056_v8 = vld [vmem:[%s2555_s1 + $0x310] sm:$0xff]  }
  0x27   :  { %1268 = vmatprep.mubr.bf16.mxu1 %v1573_v11  ;;  %v2029_v43 = vld [vmem:[%s2555_s1 + $0x280] sm:$0xff]   ;;  %v2059_v11 = vld [vmem:[%s2555_s1 + $0x3c8] sm:$0xff]  }
  0x28   :  { %1766 = vmatpush3.bf16.msra.mxu0 %v1968_v44  ;;  %v25_v44 = vld [vmem:[%s2556_s0 + $0x20] sm:$0xff] }
  0x29   :  { %1788 = vmatpush3.bf16.msra.mxu1 %v1969_v45  ;;  %1767 = vmatprep.subr.bf16.mxu0 %v1970_v46  ;;  %v26_v45 = vld [vmem:[%s2556_s0 + $0x28] sm:$0xff]  ;;  %v1574_v46 = vcombine.low %v25_v44, %v25_v44 }
  0x2a   :  { %1789 = vmatprep.subr.bf16.mxu1 %v1971_v47  ;;  %v1575_v47 = vcombine.high %v25_v44, %v25_v44 }
  0x2c   :  { %1768 = vmatpush3.bf16.msra.mxu0 %v1972_v48  ;;  %v1576_v48 = vcombine.low %v26_v45, %v26_v45 }
  0x2d   :  { %1790 = vmatpush3.bf16.msra.mxu1 %v1973_v49  ;;  %1769 = vmatprep.subr.bf16.mxu0 %v1974_v50  ;;  %v1577_v49 = vcombine.high %v26_v45, %v26_v45  ;;  %v2034_v50 = vld [vmem:[%s2555_s1 + $0x378] sm:$0xff]  }
  0x2e   :  { %1791 = vmatprep.subr.bf16.mxu1 %v1975_v51  ;;  %v2035_v51 = vld [vmem:[%s2555_s1 + $0x3f8] sm:$0xff]  }
  0x30   :  { %1770 = vmatpush3.bf16.msra.mxu0 %v1976_v52  ;;  %v2036_v52 = vld [vmem:[%s2555_s1 + $0x338] sm:$0xff]  }
  0x31   :  { %1792 = vmatpush3.bf16.msra.mxu1 %v1977_v53  ;;  %1771 = vmatprep.subr.bf16.mxu0 %v1978_v54  ;;  %v2037_v53 = vld [vmem:[%s2555_s1 + $0x3b8] sm:$0xff]   ;;  %v2038_v54 = vld [vmem:[%s2555_s1 + $0x370] sm:$0xff]  }
  0x32   :  { %1793 = vmatprep.subr.bf16.mxu1 %v1979_v55  ;;  %v2039_v55 = vld [vmem:[%s2555_s1 + $0x3f0] sm:$0xff]  }
  0x34   :  { %1772 = vmatpush3.bf16.msra.mxu0 %v1980_v56  ;;  %v2040_v56 = vld [vmem:[%s2555_s1 + $0x330] sm:$0xff]  }
  0x35   :  { %1794 = vmatpush3.bf16.msra.mxu1 %v1981_v57  ;;  %1773 = vmatprep.subr.bf16.mxu0 %v1982_v58  ;;  %v2041_v57 = vld [vmem:[%s2555_s1 + $0x3b0] sm:$0xff]   ;;  %v2042_v58 = vld [vmem:[%s2555_s1 + $0x368] sm:$0xff]  }
  0x36   :  { %1795 = vmatprep.subr.bf16.mxu1 %v1983_v59  ;;  %v2043_v59 = vld [vmem:[%s2555_s1 + $0x3e8] sm:$0xff]  }
  0x38   :  { %1774 = vmatpush3.bf16.msra.mxu0 %v1984_v60  ;;  %v2044_v60 = vld [vmem:[%s2555_s1 + $0x328] sm:$0xff]  }
  0x39   :  { %1796 = vmatpush3.bf16.msra.mxu1 %v1985_v61  ;;  %1775 = vmatprep.subr.bf16.mxu0 %v1986_v62  ;;  %v2045_v61 = vld [vmem:[%s2555_s1 + $0x3a8] sm:$0xff]   ;;  %v2046_v62 = vld [vmem:[%s2555_s1 + $0x360] sm:$0xff]  }
  0x3a   :  { %1797 = vmatprep.subr.bf16.mxu1 %v1987_v63  ;;  %v2047_v63 = vld [vmem:[%s2555_s1 + $0x3e0] sm:$0xff]  }
  0x3c   :  { %1776 = vmatpush3.bf16.msra.mxu0 %v1988_v0  ;;  %v2048_v0 = vld [vmem:[%s2555_s1 + $0x320] sm:$0xff]  }
  0x3d   :  { %1798 = vmatpush3.bf16.msra.mxu1 %v1989_v1  ;;  %1777 = vmatprep.subr.bf16.mxu0 %v1990_v2  ;;  %v2049_v1 = vld [vmem:[%s2555_s1 + $0x3a0] sm:$0xff]   ;;  %v2050_v2 = vld [vmem:[%s2555_s1 + $0x358] sm:$0xff]  }
  0x3e   :  { %1799 = vmatprep.subr.bf16.mxu1 %v1991_v3  ;;  %v2051_v3 = vld [vmem:[%s2555_s1 + $0x3d8] sm:$0xff]  }
  0x40   :  { %1778 = vmatpush3.bf16.msra.mxu0 %v1992_v4  ;;  %v2052_v4 = vld [vmem:[%s2555_s1 + $0x318] sm:$0xff]  }
  0x41   :  { %1800 = vmatpush3.bf16.msra.mxu1 %v1993_v5  ;;  %1807 = vmatprep.subr.bf16.mxu0 %v1998_v12  ;;  %v2053_v5 = vld [vmem:[%s2555_s1 + $0x398] sm:$0xff]   ;;  %v2060_v12 = vld [vmem:[%s2555_s1 + $0x308] sm:$0xff]  }
  0x42   :  { %1829 = vmatprep.subr.bf16.mxu1 %v1999_v13  ;;  %v2061_v13 = vld [vmem:[%s2555_s1 + $0x388] sm:$0xff]  }
  0x43   :  { %1229 = vmatmul.mubr.bf16.vlgmr.msra.gmra.mxu0 %v1570_v7  ;;  %v2055_v7 = vld [vmem:[%s2555_s1 + $0x3d0] sm:$0xff]  }
  0x44   :  { %1269 = vmatmul.mubr.bf16.vlgmr.msra.gmra.mxu1 %v1572_v10  ;;  %1808 = vmatpush3.bf16.msra.mxu0 %v2000_v14  ;;  %v2058_v10 = vld [vmem:[%s2555_s1 + $0x348] sm:$0xff]   ;;  %v2062_v14 = vld [vmem:[%s2555_s1 + $0x340] sm:$0xff]  }
  0x45   :  { %1830 = vmatpush3.bf16.msra.mxu1 %v2001_v15  ;;  %1809 = vmatprep.subr.bf16.mxu0 %v2002_v16  ;;  %v2063_v15 = vld [vmem:[%s2555_s1 + $0x3c0] sm:$0xff]  }
  0x46   :  { %1831 = vmatprep.subr.bf16.mxu1 %v2003_v17  ;;  %1308 = vmatprep.mubr.bf16.mxu0 %v1575_v47  ;;  %v2064_v16 = vld [vmem:[%s2555_s1 + $0x300] sm:$0xff]  }
  0x47   :  { %1348 = vmatprep.mubr.bf16.mxu1 %v1577_v49  ;;  %v2065_v17 = vld [vmem:[%s2555_s1 + $0x380] sm:$0xff]  }
  0x48   :  { %1810 = vmatpush3.bf16.msra.mxu0 %v2004_v18  ;;  %v27_v18 = vld [vmem:[%s2556_s0 + $0x30] sm:$0xff] }
  0x49   :  { %1832 = vmatpush3.bf16.msra.mxu1 %v2005_v19  ;;  %1811 = vmatprep.subr.bf16.mxu0 %v2006_v20  ;;  %v28_v19 = vld [vmem:[%s2556_s0 + $0x38] sm:$0xff]  ;;  %v1578_v20 = vcombine.low %v27_v18, %v27_v18 }
  0x4a   :  { %1833 = vmatprep.subr.bf16.mxu1 %v2007_v21  ;;  %v1579_v21 = vcombine.high %v27_v18, %v27_v18 }
  0x4c   :  { %1812 = vmatpush3.bf16.msra.mxu0 %v2008_v22  ;;  %v1580_v22 = vcombine.low %v28_v19, %v28_v19 }
  0x4d   :  { %1834 = vmatpush3.bf16.msra.mxu1 %v2009_v23  ;;  %1813 = vmatprep.subr.bf16.mxu0 %v2010_v24  ;;  %v1581_v23 = vcombine.high %v28_v19, %v28_v19  ;;  %v2082_v24 = vmov 0.0  }
  0x4e   :  { %1835 = vmatprep.subr.bf16.mxu1 %v2011_v25  ;;  %v2070_v25 = vld [vmem:[%s2557_s3 + $0x38] sm:$0xff]  }
  0x50   :  { %1814 = vmatpush3.bf16.msra.mxu0 %v2012_v26  ;;  %v2071_v26 = vld [vmem:[%s2557_s3 + $0x30] sm:$0xff]  }
  0x51   :  { %1836 = vmatpush3.bf16.msra.mxu1 %v2013_v27  ;;  %1815 = vmatprep.subr.bf16.mxu0 %v2014_v28  ;;  %v2072_v27 = vld [vmem:[%s2557_s3 + $0x28] sm:$0xff]   ;;  %v2073_v28 = vld [vmem:[%s2557_s3 + $0x20] sm:$0xff]  }
  0x52   :  { %1837 = vmatprep.subr.bf16.mxu1 %v2015_v29  ;;  %v2074_v29 = vld [vmem:[%s2557_s3 + $0x18] sm:$0xff]  }
  0x54   :  { %1816 = vmatpush3.bf16.msra.mxu0 %v2016_v30  ;;  %v2075_v30 = vld [vmem:[%s2557_s3 + $0x10] sm:$0xff]  }
  0x55   :  { %1838 = vmatpush3.bf16.msra.mxu1 %v2017_v31  ;;  %1817 = vmatprep.subr.bf16.mxu0 %v2018_v32  ;;  %v2076_v31 = vld [vmem:[%s2557_s3 + $0x8] sm:$0xff]   ;;  %v2077_v32 = vld [vmem:[%s2557_s3] sm:$0xff]  }
  0x56   :  { %1839 = vmatprep.subr.bf16.mxu1 %v2019_v33 }
  0x58   :  { %1818 = vmatpush3.bf16.msra.mxu0 %v2020_v34 }
  0x59   :  { %1840 = vmatpush3.bf16.msra.mxu1 %v2021_v35  ;;  %1819 = vmatprep.subr.bf16.mxu0 %v2022_v36  ;;  %v1565_v35 = vld [vmem:[%s2558_s2] ss:$0 sm:$0xff] }
  0x5a   :  { %1841 = vmatprep.subr.bf16.mxu1 %v2023_v37 }
  0x5c   :  { %1820 = vmatpush3.bf16.msra.mxu0 %v2024_v38 }
  0x5d   :  { %1842 = vmatpush3.bf16.msra.mxu1 %v2025_v39  ;;  %1821 = vmatprep.subr.bf16.mxu0 %v2026_v40 }
  0x5e   :  { %1843 = vmatprep.subr.bf16.mxu1 %v2027_v41 }
  0x60   :  { %1822 = vmatpush3.bf16.msra.mxu0 %v2028_v42 }
  0x61   :  { %1844 = vmatpush3.bf16.msra.mxu1 %v2029_v43  ;;  %1851 = vmatprep.subr.bf16.mxu0 %v2034_v50 }
  0x62   :  { %1873 = vmatprep.subr.bf16.mxu1 %v2035_v51 }
  0x63   :  { %1309 = vmatmul.mubr.bf16.vlgmr.msra.gmra.mxu0 %v1574_v46 }
  0x64   :  { %1349 = vmatmul.mubr.bf16.vlgmr.msra.gmra.mxu1 %v1576_v48  ;;  %1852 = vmatpush3.bf16.msra.mxu0 %v2036_v52 }
  0x65   :  { %1874 = vmatpush3.bf16.msra.mxu1 %v2037_v53  ;;  %1853 = vmatprep.subr.bf16.mxu0 %v2038_v54 }
  0x66   :  { %1875 = vmatprep.subr.bf16.mxu1 %v2039_v55  ;;  %1388 = vmatprep.mubr.bf16.mxu0 %v1579_v21 }
  0x67   :  { %1428 = vmatprep.mubr.bf16.mxu1 %v1581_v23 }
  0x68   :  { %1854 = vmatpush3.bf16.msra.mxu0 %v2040_v56 }
  0x69   :  { %1876 = vmatpush3.bf16.msra.mxu1 %v2041_v57  ;;  %1855 = vmatprep.subr.bf16.mxu0 %v2042_v58 }
  0x6a   :  { %1877 = vmatprep.subr.bf16.mxu1 %v2043_v59 }
  0x6c   :  { %1856 = vmatpush3.bf16.msra.mxu0 %v2044_v60 }
  0x6d   :  { %1878 = vmatpush3.bf16.msra.mxu1 %v2045_v61  ;;  %1857 = vmatprep.subr.bf16.mxu0 %v2046_v62 }
  0x6e   :  { %1879 = vmatprep.subr.bf16.mxu1 %v2047_v63 }
  0x70   :  { %1858 = vmatpush3.bf16.msra.mxu0 %v2048_v0 }
  0x71   :  { %1880 = vmatpush3.bf16.msra.mxu1 %v2049_v1  ;;  %1859 = vmatprep.subr.bf16.mxu0 %v2050_v2 }
  0x72   :  { %1881 = vmatprep.subr.bf16.mxu1 %v2051_v3 }
  0x74   :  { %1860 = vmatpush3.bf16.msra.mxu0 %v2052_v4 }
  0x75   :  { %1882 = vmatpush3.bf16.msra.mxu1 %v2053_v5  ;;  %1861 = vmatprep.subr.bf16.mxu0 %v2054_v6 }
  0x76   :  { %1883 = vmatprep.subr.bf16.mxu1 %v2055_v7 }
  0x78   :  { %1862 = vmatpush3.bf16.msra.mxu0 %v2056_v8 }
  0x79   :  { %1884 = vmatpush3.bf16.msra.mxu1 %v2057_v9  ;;  %1863 = vmatprep.subr.bf16.mxu0 %v2058_v10 }
  0x7a   :  { %1885 = vmatprep.subr.bf16.mxu1 %v2059_v11 }
  0x7c   :  { %1864 = vmatpush3.bf16.msra.mxu0 %v2060_v12 }
  0x7d   :  { %1886 = vmatpush3.bf16.msra.mxu1 %v2061_v13  ;;  %1865 = vmatprep.subr.bf16.mxu0 %v2062_v14 }
  0x7e   :  { %1887 = vmatprep.subr.bf16.mxu1 %v2063_v15 }
  0x80   :  { %1866 = vmatpush3.bf16.msra.mxu0 %v2064_v16 }
  0x81   :  { %1888 = vmatpush3.bf16.msra.mxu1 %v2065_v17  ;;  %1904 = vmatprep.subr.bf16.mxu0 %v2082_v24 }
  0x83   :  { %1389 = vmatmul.mubr.bf16.vlgmr.msra.gmra.mxu0 %v1578_v20  ;;  %v1710_v20 = vld [vmem:[%s2559_s4] ss:$0 sm:$0xff] }
  0x84   :  { %1429 = vmatmul.mubr.bf16.vlgmr.msra.gmra.mxu1 %v1580_v22  ;;  %1905 = vmatpush3.bf16.msra.mxu0 %v2070_v25 }
  0x85   :  { %1906 = vmatprep.subr.bf16.mxu0 %v2082_v24  ;;  %1920 = vmatprep.mubr.msk.bf16.mxu0 %vm2083_vm0, %v2082_v24 }
  0x88   :  { %1907 = vmatpush3.bf16.msra.mxu0 %v2071_v26 }
  0x89   :  { %1908 = vmatprep.subr.bf16.mxu0 %v2082_v24 }
  0x8c   :  { %1909 = vmatpush3.bf16.msra.mxu0 %v2072_v27 }
  0x8d   :  { %1910 = vmatprep.subr.bf16.mxu0 %v2082_v24 }
  0x90   :  { %1911 = vmatpush3.bf16.msra.mxu0 %v2073_v28 }
  0x91   :  { %1912 = vmatprep.subr.bf16.mxu0 %v2082_v24 }
  0x94   :  { %1913 = vmatpush3.bf16.msra.mxu0 %v2074_v29 }
  0x95   :  { %1914 = vmatprep.subr.bf16.mxu0 %v2082_v24 }
  0x98   :  { %1915 = vmatpush3.bf16.msra.mxu0 %v2075_v30 }
  0x99   :  { %1916 = vmatprep.subr.bf16.mxu0 %v2082_v24 }
  0x9c   :  { %1917 = vmatpush3.bf16.msra.mxu0 %v2076_v31 }
  0x9d   :  { %1918 = vmatprep.subr.bf16.mxu0 %v2082_v24 }
  0xa0   :  { %1919 = vmatpush3.bf16.msra.mxu0 %v2077_v32 }
  0xe3   :  { %v1735_v33 = vpop.f32.mrf.mxu0 }
  0xe4   :  { %v1757_v34 = vpop.f32.mrf.mxu1 }
  0xe5   :  { %v1736_v36 = vpop.f32.mrf.mxu0 }
  0xe6   :  { %v1758_v37 = vpop.f32.mrf.mxu1  ;;  %v1737_v38 = vadd.f32 %v1736_v36, %v1735_v33 }
  0xe7   :  { %v1759_v39 = vadd.f32 %v1758_v37, %v1757_v34  ;;  %v1738_v40 = vpop.f32.mrf.mxu0 }
  0xe8   :  { %v1760_v41 = vpop.f32.mrf.mxu1  ;;  %v1151_v42 = vadd.f32 %v1737_v38, %v1565_v35 }
  0xe9   :  { %v1739_v43 = vpop.f32.mrf.mxu0 }
  0xea   :  { %v1761_v44 = vpop.f32.mrf.mxu1  ;;  %v1191_v45 = vadd.f32 %v1759_v39, %v1151_v42 }
 0x103   :  { %v1779_v46 = vpop.f32.mrf.mxu0 }
 0x104   :  { %v1801_v47 = vpop.f32.mrf.mxu1 }
 0x105   :  { %v1780_v48 = vpop.f32.mrf.mxu0 }
 0x106   :  { %v1802_v49 = vpop.f32.mrf.mxu1  ;;  %v1781_v62 = vadd.f32 %v1780_v48, %v1779_v46 }
 0x107   :  { %v1782_v50 = vpop.f32.mrf.mxu0  ;;  %v1803_v0 = vadd.f32 %v1802_v49, %v1801_v47 }
 0x108   :  { %v1804_v51 = vpop.f32.mrf.mxu1  ;;  %v1231_v63 = vadd.f32 %v1781_v62, %v1191_v45 }
 0x109   :  { %v1783_v52 = vpop.f32.mrf.mxu0 }
 0x10a   :  { %v1805_v53 = vpop.f32.mrf.mxu1  ;;  %v1271_v2 = vadd.f32 %v1803_v0, %v1231_v63 }
 0x123   :  { %v1823_v54 = vpop.f32.mrf.mxu0 }
 0x124   :  { %v1845_v55 = vpop.f32.mrf.mxu1 }
 0x125   :  { %v1824_v56 = vpop.f32.mrf.mxu0 }
 0x126   :  { %v1846_v57 = vpop.f32.mrf.mxu1  ;;  %v1825_v1 = vadd.f32 %v1824_v56, %v1823_v54 }
 0x127   :  { %v1826_v58 = vpop.f32.mrf.mxu0  ;;  %v1847_v4 = vadd.f32 %v1846_v57, %v1845_v55 }
 0x128   :  { %v1848_v59 = vpop.f32.mrf.mxu1  ;;  %v1311_v3 = vadd.f32 %v1825_v1, %v1271_v2 }
 0x129   :  { %v1827_v60 = vpop.f32.mrf.mxu0 }
 0x12a   :  { %v1849_v61 = vpop.f32.mrf.mxu1  ;;  %v1351_v8 = vadd.f32 %v1847_v4, %v1311_v3 }
 0x143   :  { %v1867_v5 = vpop.f32.mrf.mxu0 }
 0x144   :  { %v1889_v6 = vpop.f32.mrf.mxu1 }
 0x145   :  { %v1868_v7 = vpop.f32.mrf.mxu0 }
 0x146   :  { %v1869_v9 = vadd.f32 %v1868_v7, %v1867_v5  ;;  %v1890_v10 = vpop.f32.mrf.mxu1 }
 0x147   :  { %v1870_v11 = vpop.f32.mrf.mxu0  ;;  %v1891_v13 = vadd.f32 %v1890_v10, %v1889_v6 }
 0x148   :  { %v1391_v12 = vadd.f32 %v1869_v9, %v1351_v8  ;;  %v1892_v14 = vpop.f32.mrf.mxu1 }
 0x149   :  { %v1871_v15 = vpop.f32.mrf.mxu0 }
 0x14a   :  { %v1431_v16 = vadd.f32 %v1891_v13, %v1391_v12  ;;  %v1893_v17 = vpop.f32.mrf.mxu1 }
 0x14c   :  { %v1436_v18 = vmax.f32 %v1431_v16, 0.0 }
 0x14e   :  { %v1437_v19 = vpack.c.bf16 %v1436_v18, %v1436_v18 }
 0x150   :  { %1921 = vmatmul.mubr.bf16.vlgmr.msra.gmra.mxu0 %v1437_v19 }
 0x210   :  { %v1543_v21 = vpop.f32.mrf.mxu0 }
 0x211   :  { %v1544_v22 = vadd.f32 %v1710_v20, %v1543_v21 }
 0x212   :  { %v1922_v23 = vpop.f32.mrf.mxu0 }
 0x213   :  { %1549 = vmax.xlane.f32.xlu0 %v1544_v22 }
 0x214   :  { %v1546_v24 = vpop.f32.mrf.mxu0 }
 0x216   :  { %v1923_v25 = vpop.f32.mrf.mxu0 }
 0x29c   :  { %v1550_v26 = vpop.xlane.xlu0 %1549 }
 0x29d   :  { %v1551_v27 = vsub.f32 %v1544_v22, %v1550_v26 }
 0x29f   :  { %v1552_v28 = vmul.f32 1.442695, %v1551_v27 }
 0x2a1   :  { %2078 = vpow2.f32 %v1552_v28 }
 0x2ae   :  { %v2079_v29 = vpop.eup %2078 }
 0x2af   :  { %1554 = vadd.xlane.f32.xlu0 %v2079_v29 }
 0x338   :  { %v1555_v30 = vpop.xlane.xlu0 %1554 }
 0x339   :  { %2080 = vlog2.f32 %v1555_v30 }
 0x346   :  { %v2081_v31 = vpop.eup %2080 }
 0x347   :  { %v1557_v32 = vmul.f32 0.6931472, %v2081_v31 }
 0x349   :  { %v1558_v33 = vadd.f32 %v1557_v32, %v1550_v26 }
 0x34b   :  { %v1559_v34 = vsub.f32 %v1544_v22, %v1558_v33 }
 0x34d   :  { %1560 = vst [vmem:[%s2560_s5] sm:$0xff] %v1559_v34 }

</bundles_post_ra>
